<compile_context>
chip_gen: v6e
topology: v6e:2x2x1
jax: 0.10.0
libtpu: 0.0.40
codegen_flags: <defaults>
</compile_context>

<pallas_src>
import functools
import math

import jax
import jax.numpy as jnp
from jax.experimental import pallas as pl
from jax.experimental.pallas import tpu as pltpu


def _round_up(x, m):
    return ((x + m - 1) // m) * m


def _vmem_capacity_bytes():
    try:
        return int(pltpu.get_tpu_info().vmem_capacity_bytes)
    except Exception:
        return 64 * 1024 * 1024        # conservative (v7x) fallback


def _vmem_need_bytes(S, D, H, dhp, tq, with_score, score_isize, single_buf_w):
    """Rough full per-step VMEM footprint (blocks incl. buffering + scratch +
    transients).  Used both for TQ selection and for vmem_limit_bytes."""
    Dp = H * dhp
    wbuf = 1 if single_buf_w else 2
    need = 0
    # pipelined input blocks (bf16), double buffered
    need += 2 * tq * D * 2                          # q tile
    need += 2 * 2 * S * D * 2                       # k and v full-sequence blocks
    # constant operands (weights bf16, biases f32)
    need += wbuf * (3 * D * Dp + Dp * D) * 2
    need += wbuf * (3 * Dp + D) * 4
    # pipelined output blocks, double buffered
    need += 2 * tq * D * 4                          # res f32
    if with_score:
        need += 2 * H * tq * S * score_isize        # score block
    # scratch (single copy, kernel lifetime)
    need += 2 * H * S * dhp * 2                     # resident K / V heads (bf16)
    need += tq * Dp * 2                             # ctx (bf16)
    # transient values (logits + exp f32, f32 projections before bf16 cast)
    need += 2 * H * tq * S * 4
    need += tq * Dp * 4 + S * Dp * 4
    return need


def _choose_tq(S, D, H, dhp, with_score, score_isize, single_buf_w, cap):
    """Largest query tile whose full per-step footprint fits the real VMEM
    capacity of this TPU generation (with ~10% headroom)."""
    if S % 8 != 0:
        return S                       # tiny / unaligned: single tile
    budget = int(cap * 0.9)
    cands = [c for c in (512, 256, 128, 64, 32, 16, 8) if c <= S and S % c == 0]
    if not cands:
        return S
    for c in cands:
        if _vmem_need_bytes(S, D, H, dhp, c, with_score, score_isize,
                            single_buf_w) <= budget:
            return c
    return cands[-1]


def _mha_kernel(q_ref, k_ref, v_ref,
                wq_ref, wk_ref, wv_ref, wo_ref,
                bq_ref, bk_ref, bv_ref, bo_ref,
                *outs_and_scratch,
                n_heads, kv_once, with_score, approx_recip):
    # Blocks:
    #   q        (1, TQ, D) bf16     k, v   (1, S, D)      bf16
    #   wq/wk/wv (D, Dp)    bf16     wo     (Dp, D)        bf16   (Dp = H*dhp,
    #   bq/bk/bv (1, Dp)    f32      bo     (1, D)         f32     head-padded)
    #   res      (1, TQ, D) f32      score  (1, H, TQ, S)  [optional]
    # Scratch:
    #   kh/vh (H, S, dhp) bf16 (resident across q tiles when kv_once)
    #   ctx   (TQ, Dp)    bf16
    if with_score:
        res_ref, score_ref, kh_scr, vh_scr, ctx_scr = outs_and_scratch
    else:
        res_ref, kh_scr, vh_scr, ctx_scr = outs_and_scratch
        score_ref = None

    qi = pl.program_id(1)
    H = n_heads
    S = k_ref.shape[1]
    D = q_ref.shape[2]
    dh = D // H                        # true head dim (for the softmax scale)
    dhp = kh_scr.shape[2]              # lane-aligned, zero-padded head dim
    scale = 1.0 / math.sqrt(dh)

    # ---- K / V projections (head-major, lane-aligned slices of the padded
    #      projection).  Resident across q tiles when kv_once.
    def project_kv():
        kp = (jnp.dot(k_ref[0], wk_ref[...], preferred_element_type=jnp.float32)
              + bk_ref[...]).astype(jnp.bfloat16)              # (S, Dp)
        vp = (jnp.dot(v_ref[0], wv_ref[...], preferred_element_type=jnp.float32)
              + bv_ref[...]).astype(jnp.bfloat16)
        for h in range(H):
            kh_scr[h] = kp[:, h * dhp:(h + 1) * dhp]
            vh_scr[h] = vp[:, h * dhp:(h + 1) * dhp]

    if kv_once:
        @pl.when(qi == 0)
        def _():
            project_kv()
    else:
        project_kv()

    # ---- Q projection for this tile; 1/sqrt(dh) folded in before the bf16
    #      cast.  Head split is built as a value (no scratch round trip).
    qp = (jnp.dot(q_ref[0], wq_ref[...], preferred_element_type=jnp.float32)
          + bq_ref[...]) * scale
    qb = qp.astype(jnp.bfloat16)                               # (TQ, Dp)
    q3 = jnp.stack([qb[:, h * dhp:(h + 1) * dhp] for h in range(H)], axis=0)

    # ---- Scaled dot-product attention, batched over heads (no K transpose);
    #      padded head columns are zero so the contraction is exact.
    logits = jnp.einsum("hqd,hkd->hqk", q3, kh_scr[...],
                        preferred_element_type=jnp.float32)     # (H, TQ, S) f32
    m = jnp.max(logits, axis=-1, keepdims=True)
    e = jnp.exp(logits - m)
    denom = jnp.sum(e, axis=-1, keepdims=True)
    if approx_recip:
        attn = e * pl.reciprocal(denom, approx=True)            # EUP slot
    else:
        attn = e / denom
    if with_score:
        score_ref[0] = attn.astype(score_ref.dtype)

    # ---- Context: per-head bf16 tiles written to lane-aligned slots of a
    #      (TQ, Dp) scratch, then ONE deep output-projection matmul.
    ab = attn.astype(jnp.bfloat16)
    for h in range(H):
        ch = jnp.dot(ab[h], vh_scr[h], preferred_element_type=jnp.float32)
        ctx_scr[:, h * dhp:(h + 1) * dhp] = ch.astype(jnp.bfloat16)

    out = jnp.dot(ctx_scr[...], wo_ref[...],
                  preferred_element_type=jnp.float32) + bo_ref[...]
    res_ref[0] = out


def multihead_attention(q, k, v, params, n_heads, *, tq=None,
                        return_score=True, score_dtype=jnp.float32,
                        kv_once=None, approx_recip=True,
                        single_buffer_weights=True):
    """q, k, v: (B, S, D) float32.

    Returns (res (B,S,D) f32, score (B,H,S,S) score_dtype) or just res when
    return_score=False.  Note: approx_recip=True uses the TPU approximate
    reciprocal, so score rows sum to 1 only to ~1e-3 (pass approx_recip=False
    for an exact softmax)."""
    B, S, D = q.shape
    assert D % n_heads == 0
    dh = D // n_heads
    dhp = _round_up(dh, 128)            # lane-aligned + MXU-deep head dim
    Dp = n_heads * dhp
    wq, wk, wv, wo, bq, bk, bv, bo = params

    # --- head-padded, bf16 operand layouts (zero padding -> exact results). ---
    def pad_w_cols(w):                  # (D, D) -> (D, H*dhp)
        w3 = w.reshape(D, n_heads, dh)
        if dhp != dh:
            w3 = jnp.pad(w3, ((0, 0), (0, 0), (0, dhp - dh)))
        return w3.reshape(D, Dp).astype(jnp.bfloat16)

    def pad_b(b):                       # (1,1,D) -> (1, H*dhp) f32
        b2 = b.reshape(n_heads, dh)
        if dhp != dh:
            b2 = jnp.pad(b2, ((0, 0), (0, dhp - dh)))
        return b2.reshape(1, Dp).astype(jnp.float32)

    wqp, wkp, wvp = pad_w_cols(wq), pad_w_cols(wk), pad_w_cols(wv)
    wo3 = wo.reshape(n_heads, dh, D)
    if dhp != dh:
        wo3 = jnp.pad(wo3, ((0, 0), (0, dhp - dh), (0, 0)))
    wop = wo3.reshape(Dp, D).astype(jnp.bfloat16)               # (H*dhp, D)
    bqp, bkp, bvp = pad_b(bq), pad_b(bk), pad_b(bv)
    bop = bo.reshape(1, D).astype(jnp.float32)

    qb = q.astype(jnp.bfloat16)
    kb = k.astype(jnp.bfloat16)
    vb = v.astype(jnp.bfloat16)

    # --- generation-aware tiling / scoped-VMEM limit. ---
    cap = _vmem_capacity_bytes()
    score_isize = jnp.dtype(score_dtype).itemsize if return_score else 0
    if tq is None:
        tq = _choose_tq(S, D, n_heads, dhp, return_score, score_isize,
                        single_buffer_weights, cap)
    assert S % tq == 0
    nq = S // tq
    if kv_once is None:
        # Resident K/V only pays off with several q tiles; with B==1 we prefer
        # recomputation so the q-tile axis can be sharded across cores (v7x).
        kv_once = (nq > 1 and B >= 2)
    dims = ("parallel", "arbitrary") if kv_once else ("parallel", "parallel")

    need = _vmem_need_bytes(S, D, n_heads, dhp, tq, return_score, score_isize,
                            single_buffer_weights)
    vmem_limit = int(min(cap, max(need + (8 << 20), 32 << 20)))

    kernel = functools.partial(_mha_kernel, n_heads=n_heads, kv_once=kv_once,
                               with_score=return_score,
                               approx_recip=approx_recip)

    out_shapes = [jax.ShapeDtypeStruct((B, S, D), jnp.float32)]
    out_specs_list = [pl.BlockSpec((1, tq, D), lambda b, i: (b, i, 0))]
    if return_score:
        out_shapes.append(jax.ShapeDtypeStruct((B, n_heads, S, S), score_dtype))
        out_specs_list.append(
            pl.BlockSpec((1, n_heads, tq, S), lambda b, i: (b, 0, i, 0)))

    scratch_shapes = [
        pltpu.VMEM((n_heads, S, dhp), jnp.bfloat16),   # K heads (resident)
        pltpu.VMEM((n_heads, S, dhp), jnp.bfloat16),   # V heads (resident)
        pltpu.VMEM((tq, Dp), jnp.bfloat16),            # context (per tile)
    ]

    def build_and_run(single_buf):
        # Constant operands: single-buffered (index_map is constant over the
        # whole grid, so double-buffering would only waste VMEM).
        const_kw = dict(pipeline_mode=pl.Buffered(1)) if single_buf else {}
        q_spec = pl.BlockSpec((1, tq, D), lambda b, i: (b, i, 0))
        kv_spec = pl.BlockSpec((1, S, D), lambda b, i: (b, 0, 0))
        w_spec = pl.BlockSpec((D, Dp), lambda b, i: (0, 0), **const_kw)
        wo_spec = pl.BlockSpec((Dp, D), lambda b, i: (0, 0), **const_kw)
        b_spec = pl.BlockSpec((1, Dp), lambda b, i: (0, 0), **const_kw)
        bo_spec = pl.BlockSpec((1, D), lambda b, i: (0, 0), **const_kw)

        fn = pl.pallas_call(
            kernel,
            out_shape=tuple(out_shapes) if return_score else out_shapes[0],
            grid_spec=pltpu.PrefetchScalarGridSpec(
                num_scalar_prefetch=0,
                grid=(B, nq),
                in_specs=[q_spec, kv_spec, kv_spec,
                          w_spec, w_spec, w_spec, wo_spec,
                          b_spec, b_spec, b_spec, bo_spec],
                out_specs=(tuple(out_specs_list) if return_score
                           else out_specs_list[0]),
                scratch_shapes=scratch_shapes,
            ),
            compiler_params=pltpu.CompilerParams(
                dimension_semantics=dims,
                vmem_limit_bytes=vmem_limit,
            ),
        )
        return fn(qb, kb, vb, wqp, wkp, wvp, wop, bqp, bkp, bvp, bop)

    if single_buffer_weights:
        try:
            return build_and_run(True)
        except Exception:
            # TODO(synk): pl.Buffered(1) unsupported on this Pallas build;
            # fall back to default double buffering of the constant operands.
            pass
    return build_and_run(False)


def init_params(key, d_model):
    """Deterministic xavier-style init matching the module's _reset_parameters."""
    ks = jax.random.split(key, 8)
    wb = math.sqrt(6.0 / (2.0 * d_model))      # xavier_uniform_ on (D, D)
    wq = jax.random.uniform(ks[0], (d_model, d_model), jnp.float32, -wb, wb)
    wk = jax.random.uniform(ks[1], (d_model, d_model), jnp.float32, -wb, wb)
    wv = jax.random.uniform(ks[2], (d_model, d_model), jnp.float32, -wb, wb)
    wo = jax.random.uniform(ks[3], (d_model, d_model), jnp.float32, -wb, wb)
    bstd = math.sqrt(1.0 / d_model)            # xavier_normal_ on (1, 1, D)
    bq = bstd * jax.random.normal(ks[4], (1, 1, d_model), jnp.float32)
    bk = bstd * jax.random.normal(ks[5], (1, 1, d_model), jnp.float32)
    bv = bstd * jax.random.normal(ks[6], (1, 1, d_model), jnp.float32)
    bo = bstd * jax.random.normal(ks[7], (1, 1, d_model), jnp.float32)
    return wq, wk, wv, wo, bq, bk, bv, bo


def reference_mha(q, k, v, params, n_heads):
    """Pure-JAX reference (f32) for correctness checking."""
    wq, wk, wv, wo, bq, bk, bv, bo = params
    B, S, D = q.shape
    dh = D // n_heads
    qp = q @ wq + bq
    kp = k @ wk + bk
    vp = v @ wv + bv

    def split(x):  # (B, S, D) -> (B, H, S, dh)
        return x.reshape(B, S, n_heads, dh).transpose(0, 2, 1, 3)

    qh, kh, vh = split(qp), split(kp), split(vp)
    logits = jnp.einsum("bhqd,bhkd->bhqk", qh, kh) / math.sqrt(dh)
    score = jax.nn.softmax(logits, axis=-1)
    ctx = jnp.einsum("bhqk,bhkd->bhqd", score, vh)
    ctx = ctx.transpose(0, 2, 1, 3).reshape(B, S, D)
    res = ctx @ wo + bo
    return res, score


if __name__ == "__main__":
    B, S, D, H = 2, 16, 32, 4

    key = jax.random.PRNGKey(0)
    kq, kk, kv_, kp = jax.random.split(key, 4)
    q = jax.random.normal(kq, (B, S, D), jnp.float32)
    k = jax.random.normal(kk, (B, S, D), jnp.float32)
    v = jax.random.normal(kv_, (B, S, D), jnp.float32)
    params = init_params(kp, D)

    # Default path (auto tile, f32 score to match the PyTorch module).
    res, score = multihead_attention(q, k, v, params, H)
    res, score = jax.block_until_ready((res, score))
    assert res.shape == (B, S, D) and score.shape == (B, H, S, S)

    # Loose check vs. the pure-f32 module semantics (kernel uses bf16 MXU inputs).
    res_f32, score_f32 = reference_mha(q, k, v, params, H)
    assert jnp.allclose(res, res_f32, atol=1e-1, rtol=1e-1)
    assert jnp.allclose(score, score_f32, atol=1e-1, rtol=1e-1)

    # Tight check vs. a reference fed the same bf16-rounded inputs/weights.
    def r(x):
        return x.astype(jnp.bfloat16).astype(jnp.float32)
    params_r = tuple(r(p) if p.ndim == 2 else p for p in params)
    res_ref, score_ref = reference_mha(r(q), r(k), r(v), params_r, H)
    assert jnp.allclose(res, res_ref, atol=3e-2, rtol=3e-2)
    assert jnp.allclose(score, score_ref, atol=3e-2, rtol=3e-2)

    # Multi-tile path with resident K/V projection (q-tile axis "arbitrary").
    res_t, score_t = multihead_attention(q, k, v, params, H, tq=8)
    res_t, score_t = jax.block_until_ready((res_t, score_t))
    assert jnp.allclose(res_t, res, atol=1e-4, rtol=1e-4)
    assert jnp.allclose(score_t, score, atol=1e-4, rtol=1e-4)

    # Fully-parallel path: K/V projection recomputed per q tile (small-batch /
    # v7x megacore friendly).
    res_p, score_p = multihead_attention(q, k, v, params, H, tq=8, kv_once=False)
    res_p, score_p = jax.block_until_ready((res_p, score_p))
    assert jnp.allclose(res_p, res, atol=1e-4, rtol=1e-4)
    assert jnp.allclose(score_p, score, atol=1e-4, rtol=1e-4)

    # Flash-style fast path: no score writeback at all.
    res_ns = multihead_attention(q, k, v, params, H, tq=8, return_score=False)
    res_ns = jax.block_until_ready(res_ns)
    assert res_ns.shape == (B, S, D)
    assert jnp.allclose(res_ns, res, atol=1e-4, rtol=1e-4)

    print("KERNEL_OK")
</pallas_src>

<mosaic_0001>
module attributes {stable_mosaic.version = 11 : i64} {
  func.func @_mha_kernel(%arg0: i32, %arg1: i32, %arg2: memref<1x16x32xbf16, #tpu.memory_space<vmem>>, %arg3: memref<1x16x32xbf16, #tpu.memory_space<vmem>>, %arg4: memref<1x16x32xbf16, #tpu.memory_space<vmem>>, %arg5: memref<32x512xbf16, #tpu.memory_space<vmem>>, %arg6: memref<32x512xbf16, #tpu.memory_space<vmem>>, %arg7: memref<32x512xbf16, #tpu.memory_space<vmem>>, %arg8: memref<512x32xbf16, #tpu.memory_space<vmem>>, %arg9: memref<1x512xf32, #tpu.memory_space<vmem>>, %arg10: memref<1x512xf32, #tpu.memory_space<vmem>>, %arg11: memref<1x512xf32, #tpu.memory_space<vmem>>, %arg12: memref<1x32xf32, #tpu.memory_space<vmem>>, %arg13: memref<1x16x32xf32, #tpu.memory_space<vmem>>, %arg14: memref<1x4x16x16xf32, #tpu.memory_space<vmem>>, %arg15: memref<4x16x128xbf16, #tpu.memory_space<vmem>>, %arg16: memref<4x16x128xbf16, #tpu.memory_space<vmem>>, %arg17: memref<16x512xbf16, #tpu.memory_space<vmem>>) attributes {dimension_semantics = [#tpu.dimension_semantics<parallel>, #tpu.dimension_semantics<parallel>], iteration_bounds = array<i64: 2, 1>, scalar_prefetch = 0 : i64, scratch_operands = 3 : i64, tpu.core_type = #tpu.core_type<tc>, window_params = [{transform_indices = @transform_0, window_bounds = array<i64: 1, 16, 32>}, {transform_indices = @transform_1, window_bounds = array<i64: 1, 16, 32>}, {transform_indices = @transform_2, window_bounds = array<i64: 1, 16, 32>}, {pipeline_mode = #tpu.pipeline_mode<synchronous>, transform_indices = @transform_3, window_bounds = array<i64: 32, 512>}, {pipeline_mode = #tpu.pipeline_mode<synchronous>, transform_indices = @transform_4, window_bounds = array<i64: 32, 512>}, {pipeline_mode = #tpu.pipeline_mode<synchronous>, transform_indices = @transform_5, window_bounds = array<i64: 32, 512>}, {pipeline_mode = #tpu.pipeline_mode<synchronous>, transform_indices = @transform_6, window_bounds = array<i64: 512, 32>}, {pipeline_mode = #tpu.pipeline_mode<synchronous>, transform_indices = @transform_7, window_bounds = array<i64: 1, 512>}, {pipeline_mode = #tpu.pipeline_mode<synchronous>, transform_indices = @transform_8, window_bounds = array<i64: 1, 512>}, {pipeline_mode = #tpu.pipeline_mode<synchronous>, transform_indices = @transform_9, window_bounds = array<i64: 1, 512>}, {pipeline_mode = #tpu.pipeline_mode<synchronous>, transform_indices = @transform_10, window_bounds = array<i64: 1, 32>}, {transform_indices = @transform_11, window_bounds = array<i64: 1, 16, 32>}, {transform_indices = @transform_12, window_bounds = array<i64: 1, 4, 16, 16>}]} {
    %c0 = arith.constant 0 : index
    %c0_0 = arith.constant 0 : index
    %c0_1 = arith.constant 0 : index
    %0 = vector.load %arg3[%c0, %c0_0, %c0_1] : memref<1x16x32xbf16, #tpu.memory_space<vmem>>, vector<1x16x32xbf16>
    %1 = vector.shape_cast %0 : vector<1x16x32xbf16> to vector<16x32xbf16>
    %c0_2 = arith.constant 0 : index
    %c0_3 = arith.constant 0 : index
    %2 = vector.load %arg6[%c0_2, %c0_3] : memref<32x512xbf16, #tpu.memory_space<vmem>>, vector<32x512xbf16>
    %cst = arith.constant dense<0.000000e+00> : vector<16x512xf32>
    %3 = tpu.matmul %1, %2, %cst {dimension_numbers = #tpu.dot_dimension_numbers<[1], [0], [0], [1], [0, 0, 1, 1], [], []>} : vector<16x32xbf16>, vector<32x512xbf16>, vector<16x512xf32> -> vector<16x512xf32>
    %c0_4 = arith.constant 0 : index
    %c0_5 = arith.constant 0 : index
    %4 = vector.load %arg10[%c0_4, %c0_5] : memref<1x512xf32, #tpu.memory_space<vmem>>, vector<1x512xf32>
    %5 = vector.broadcast %4 : vector<1x512xf32> to vector<16x512xf32>
    %6 = arith.addf %3, %5 : vector<16x512xf32>
    %7 = arith.truncf %6 : vector<16x512xf32> to vector<16x512xbf16>
    %c0_6 = arith.constant 0 : index
    %c0_7 = arith.constant 0 : index
    %c0_8 = arith.constant 0 : index
    %8 = vector.load %arg4[%c0_6, %c0_7, %c0_8] : memref<1x16x32xbf16, #tpu.memory_space<vmem>>, vector<1x16x32xbf16>
    %9 = vector.shape_cast %8 : vector<1x16x32xbf16> to vector<16x32xbf16>
    %c0_9 = arith.constant 0 : index
    %c0_10 = arith.constant 0 : index
    %10 = vector.load %arg7[%c0_9, %c0_10] : memref<32x512xbf16, #tpu.memory_space<vmem>>, vector<32x512xbf16>
    %cst_11 = arith.constant dense<0.000000e+00> : vector<16x512xf32>
    %11 = tpu.matmul %9, %10, %cst_11 {dimension_numbers = #tpu.dot_dimension_numbers<[1], [0], [0], [1], [0, 0, 1, 1], [], []>} : vector<16x32xbf16>, vector<32x512xbf16>, vector<16x512xf32> -> vector<16x512xf32>
    %c0_12 = arith.constant 0 : index
    %c0_13 = arith.constant 0 : index
    %12 = vector.load %arg11[%c0_12, %c0_13] : memref<1x512xf32, #tpu.memory_space<vmem>>, vector<1x512xf32>
    %13 = vector.broadcast %12 : vector<1x512xf32> to vector<16x512xf32>
    %14 = arith.addf %11, %13 : vector<16x512xf32>
    %15 = arith.truncf %14 : vector<16x512xf32> to vector<16x512xbf16>
    %16 = vector.extract_strided_slice %7 {offsets = [0, 0], sizes = [16, 128], strides = [1, 1]} : vector<16x512xbf16> to vector<16x128xbf16>
    %c0_14 = arith.constant 0 : index
    %c0_15 = arith.constant 0 : index
    %c0_16 = arith.constant 0 : index
    %17 = vector.load %arg15[%c0_14, %c0_15, %c0_16] : memref<4x16x128xbf16, #tpu.memory_space<vmem>>, vector<1x16x128xbf16>
    %18 = vector.shape_cast %17 : vector<1x16x128xbf16> to vector<16x128xbf16>
    %19 = vector.shape_cast %16 : vector<16x128xbf16> to vector<1x16x128xbf16>
    tpu.vector_store %arg15[%c0_14, %c0_15, %c0_16], %19 {strides = array<i32>} : memref<4x16x128xbf16, #tpu.memory_space<vmem>>, vector<1x16x128xbf16>,
    %20 = vector.extract_strided_slice %15 {offsets = [0, 0], sizes = [16, 128], strides = [1, 1]} : vector<16x512xbf16> to vector<16x128xbf16>
    %c0_17 = arith.constant 0 : index
    %c0_18 = arith.constant 0 : index
    %c0_19 = arith.constant 0 : index
    %21 = vector.load %arg16[%c0_17, %c0_18, %c0_19] : memref<4x16x128xbf16, #tpu.memory_space<vmem>>, vector<1x16x128xbf16>
    %22 = vector.shape_cast %21 : vector<1x16x128xbf16> to vector<16x128xbf16>
    %23 = vector.shape_cast %20 : vector<16x128xbf16> to vector<1x16x128xbf16>
    tpu.vector_store %arg16[%c0_17, %c0_18, %c0_19], %23 {strides = array<i32>} : memref<4x16x128xbf16, #tpu.memory_space<vmem>>, vector<1x16x128xbf16>,
    %24 = vector.extract_strided_slice %7 {offsets = [0, 128], sizes = [16, 128], strides = [1, 1]} : vector<16x512xbf16> to vector<16x128xbf16>
    %c1 = arith.constant 1 : index
    %c0_20 = arith.constant 0 : index
    %c0_21 = arith.constant 0 : index
    %25 = vector.load %arg15[%c1, %c0_20, %c0_21] : memref<4x16x128xbf16, #tpu.memory_space<vmem>>, vector<1x16x128xbf16>
    %26 = vector.shape_cast %25 : vector<1x16x128xbf16> to vector<16x128xbf16>
    %27 = vector.shape_cast %24 : vector<16x128xbf16> to vector<1x16x128xbf16>
    tpu.vector_store %arg15[%c1, %c0_20, %c0_21], %27 {strides = array<i32>} : memref<4x16x128xbf16, #tpu.memory_space<vmem>>, vector<1x16x128xbf16>,
    %28 = vector.extract_strided_slice %15 {offsets = [0, 128], sizes = [16, 128], strides = [1, 1]} : vector<16x512xbf16> to vector<16x128xbf16>
    %c1_22 = arith.constant 1 : index
    %c0_23 = arith.constant 0 : index
    %c0_24 = arith.constant 0 : index
    %29 = vector.load %arg16[%c1_22, %c0_23, %c0_24] : memref<4x16x128xbf16, #tpu.memory_space<vmem>>, vector<1x16x128xbf16>
    %30 = vector.shape_cast %29 : vector<1x16x128xbf16> to vector<16x128xbf16>
    %31 = vector.shape_cast %28 : vector<16x128xbf16> to vector<1x16x128xbf16>
    tpu.vector_store %arg16[%c1_22, %c0_23, %c0_24], %31 {strides = array<i32>} : memref<4x16x128xbf16, #tpu.memory_space<vmem>>, vector<1x16x128xbf16>,
    %32 = vector.extract_strided_slice %7 {offsets = [0, 256], sizes = [16, 128], strides = [1, 1]} : vector<16x512xbf16> to vector<16x128xbf16>
    %c2 = arith.constant 2 : index
    %c0_25 = arith.constant 0 : index
    %c0_26 = arith.constant 0 : index
    %33 = vector.load %arg15[%c2, %c0_25, %c0_26] : memref<4x16x128xbf16, #tpu.memory_space<vmem>>, vector<1x16x128xbf16>
    %34 = vector.shape_cast %33 : vector<1x16x128xbf16> to vector<16x128xbf16>
    %35 = vector.shape_cast %32 : vector<16x128xbf16> to vector<1x16x128xbf16>
    tpu.vector_store %arg15[%c2, %c0_25, %c0_26], %35 {strides = array<i32>} : memref<4x16x128xbf16, #tpu.memory_space<vmem>>, vector<1x16x128xbf16>,
    %36 = vector.extract_strided_slice %15 {offsets = [0, 256], sizes = [16, 128], strides = [1, 1]} : vector<16x512xbf16> to vector<16x128xbf16>
    %c2_27 = arith.constant 2 : index
    %c0_28 = arith.constant 0 : index
    %c0_29 = arith.constant 0 : index
    %37 = vector.load %arg16[%c2_27, %c0_28, %c0_29] : memref<4x16x128xbf16, #tpu.memory_space<vmem>>, vector<1x16x128xbf16>
    %38 = vector.shape_cast %37 : vector<1x16x128xbf16> to vector<16x128xbf16>
    %39 = vector.shape_cast %36 : vector<16x128xbf16> to vector<1x16x128xbf16>
    tpu.vector_store %arg16[%c2_27, %c0_28, %c0_29], %39 {strides = array<i32>} : memref<4x16x128xbf16, #tpu.memory_space<vmem>>, vector<1x16x128xbf16>,
    %40 = vector.extract_strided_slice %7 {offsets = [0, 384], sizes = [16, 128], strides = [1, 1]} : vector<16x512xbf16> to vector<16x128xbf16>
    %c3 = arith.constant 3 : index
    %c0_30 = arith.constant 0 : index
    %c0_31 = arith.constant 0 : index
    %41 = vector.load %arg15[%c3, %c0_30, %c0_31] : memref<4x16x128xbf16, #tpu.memory_space<vmem>>, vector<1x16x128xbf16>
    %42 = vector.shape_cast %41 : vector<1x16x128xbf16> to vector<16x128xbf16>
    %43 = vector.shape_cast %40 : vector<16x128xbf16> to vector<1x16x128xbf16>
    tpu.vector_store %arg15[%c3, %c0_30, %c0_31], %43 {strides = array<i32>} : memref<4x16x128xbf16, #tpu.memory_space<vmem>>, vector<1x16x128xbf16>,
    %44 = vector.extract_strided_slice %15 {offsets = [0, 384], sizes = [16, 128], strides = [1, 1]} : vector<16x512xbf16> to vector<16x128xbf16>
    %c3_32 = arith.constant 3 : index
    %c0_33 = arith.constant 0 : index
    %c0_34 = arith.constant 0 : index
    %45 = vector.load %arg16[%c3_32, %c0_33, %c0_34] : memref<4x16x128xbf16, #tpu.memory_space<vmem>>, vector<1x16x128xbf16>
    %46 = vector.shape_cast %45 : vector<1x16x128xbf16> to vector<16x128xbf16>
    %47 = vector.shape_cast %44 : vector<16x128xbf16> to vector<1x16x128xbf16>
    tpu.vector_store %arg16[%c3_32, %c0_33, %c0_34], %47 {strides = array<i32>} : memref<4x16x128xbf16, #tpu.memory_space<vmem>>, vector<1x16x128xbf16>,
    %c0_35 = arith.constant 0 : index
    %c0_36 = arith.constant 0 : index
    %c0_37 = arith.constant 0 : index
    %48 = vector.load %arg2[%c0_35, %c0_36, %c0_37] : memref<1x16x32xbf16, #tpu.memory_space<vmem>>, vector<1x16x32xbf16>
    %49 = vector.shape_cast %48 : vector<1x16x32xbf16> to vector<16x32xbf16>
    %c0_38 = arith.constant 0 : index
    %c0_39 = arith.constant 0 : index
    %50 = vector.load %arg5[%c0_38, %c0_39] : memref<32x512xbf16, #tpu.memory_space<vmem>>, vector<32x512xbf16>
    %cst_40 = arith.constant dense<0.000000e+00> : vector<16x512xf32>
    %51 = tpu.matmul %49, %50, %cst_40 {dimension_numbers = #tpu.dot_dimension_numbers<[1], [0], [0], [1], [0, 0, 1, 1], [], []>} : vector<16x32xbf16>, vector<32x512xbf16>, vector<16x512xf32> -> vector<16x512xf32>
    %c0_41 = arith.constant 0 : index
    %c0_42 = arith.constant 0 : index
    %52 = vector.load %arg9[%c0_41, %c0_42] : memref<1x512xf32, #tpu.memory_space<vmem>>, vector<1x512xf32>
    %53 = vector.broadcast %52 : vector<1x512xf32> to vector<16x512xf32>
    %54 = arith.addf %51, %53 : vector<16x512xf32>
    %cst_43 = arith.constant 0.353553385 : f32
    %55 = vector.broadcast %cst_43 : f32 to vector<16x512xf32>
    %56 = arith.mulf %54, %55 : vector<16x512xf32>
    %57 = arith.truncf %56 : vector<16x512xf32> to vector<16x512xbf16>
    %58 = vector.extract_strided_slice %57 {offsets = [0, 0], sizes = [16, 128], strides = [1, 1]} : vector<16x512xbf16> to vector<16x128xbf16>
    %59 = vector.extract_strided_slice %57 {offsets = [0, 128], sizes = [16, 128], strides = [1, 1]} : vector<16x512xbf16> to vector<16x128xbf16>
    %60 = vector.extract_strided_slice %57 {offsets = [0, 256], sizes = [16, 128], strides = [1, 1]} : vector<16x512xbf16> to vector<16x128xbf16>
    %61 = vector.extract_strided_slice %57 {offsets = [0, 384], sizes = [16, 128], strides = [1, 1]} : vector<16x512xbf16> to vector<16x128xbf16>
    %62 = vector.shape_cast %58 : vector<16x128xbf16> to vector<1x16x128xbf16>
    %63 = vector.shape_cast %59 : vector<16x128xbf16> to vector<1x16x128xbf16>
    %64 = vector.shape_cast %60 : vector<16x128xbf16> to vector<1x16x128xbf16>
    %65 = vector.shape_cast %61 : vector<16x128xbf16> to vector<1x16x128xbf16>
    %66 = tpu.concatenate %62, %63, %64, %65 in 0 : vector<1x16x128xbf16>, vector<1x16x128xbf16>, vector<1x16x128xbf16>, vector<1x16x128xbf16> -> vector<4x16x128xbf16>
    %c0_44 = arith.constant 0 : index
    %c0_45 = arith.constant 0 : index
    %c0_46 = arith.constant 0 : index
    %67 = vector.load %arg15[%c0_44, %c0_45, %c0_46] : memref<4x16x128xbf16, #tpu.memory_space<vmem>>, vector<4x16x128xbf16>
    "tpu.trace_start"() <{level = 10 : i32, message = "hqd,hkd->hqk"}> : () -> ()
    %cst_47 = arith.constant dense<0.000000e+00> : vector<4x16x16xf32>
    %68 = tpu.matmul %66, %67, %cst_47 {dimension_numbers = #tpu.dot_dimension_numbers<[2], [2], [1], [1], [0, 0, 0, 1, 1, 1], [0], [0]>} : vector<4x16x128xbf16>, vector<4x16x128xbf16>, vector<4x16x16xf32> -> vector<4x16x16xf32>
    "tpu.trace_stop"() : () -> ()
    %cst_48 = arith.constant dense<0xFF800000> : vector<4x16xf32>
    %69 = vector.multi_reduction <maximumf>, %68, %cst_48 [2] : vector<4x16x16xf32> to vector<4x16xf32>
    %70 = vector.shape_cast %69 : vector<4x16xf32> to vector<4x16x1xf32>
    %71 = vector.broadcast %70 : vector<4x16x1xf32> to vector<4x16x16xf32>
    %72 = arith.subf %68, %71 : vector<4x16x16xf32>
    %73 = math.exp %72 : vector<4x16x16xf32>
    %cst_49 = arith.constant dense<0.000000e+00> : vector<4x16xf32>
    %74 = vector.multi_reduction <add>, %73, %cst_49 [2] : vector<4x16x16xf32> to vector<4x16xf32>
    %75 = vector.shape_cast %74 : vector<4x16xf32> to vector<4x16x1xf32>
    %76 = tpu.reciprocal %75 {approx = true} : vector<4x16x1xf32> -> vector<4x16x1xf32>
    %77 = vector.broadcast %76 : vector<4x16x1xf32> to vector<4x16x16xf32>
    %78 = arith.mulf %73, %77 : vector<4x16x16xf32>
    %c0_50 = arith.constant 0 : index
    %c0_51 = arith.constant 0 : index
    %c0_52 = arith.constant 0 : index
    %c0_53 = arith.constant 0 : index
    %79 = vector.load %arg14[%c0_50, %c0_51, %c0_52, %c0_53] : memref<1x4x16x16xf32, #tpu.memory_space<vmem>>, vector<1x4x16x16xf32>
    %80 = vector.shape_cast %79 : vector<1x4x16x16xf32> to vector<4x16x16xf32>
    %81 = vector.shape_cast %78 : vector<4x16x16xf32> to vector<1x4x16x16xf32>
    tpu.vector_store %arg14[%c0_50, %c0_51, %c0_52, %c0_53], %81 {strides = array<i32>} : memref<1x4x16x16xf32, #tpu.memory_space<vmem>>, vector<1x4x16x16xf32>,
    %82 = arith.truncf %78 : vector<4x16x16xf32> to vector<4x16x16xbf16>
    %83 = vector.extract_strided_slice %82 {offsets = [0, 0, 0], sizes = [1, 16, 16], strides = [1, 1, 1]} : vector<4x16x16xbf16> to vector<1x16x16xbf16>
    %84 = vector.shape_cast %83 : vector<1x16x16xbf16> to vector<16x16xbf16>
    %c0_54 = arith.constant 0 : index
    %c0_55 = arith.constant 0 : index
    %c0_56 = arith.constant 0 : index
    %85 = vector.load %arg16[%c0_54, %c0_55, %c0_56] : memref<4x16x128xbf16, #tpu.memory_space<vmem>>, vector<1x16x128xbf16>
    %86 = vector.shape_cast %85 : vector<1x16x128xbf16> to vector<16x128xbf16>
    %cst_57 = arith.constant dense<0.000000e+00> : vector<16x128xf32>
    %87 = tpu.matmul %84, %86, %cst_57 {dimension_numbers = #tpu.dot_dimension_numbers<[1], [0], [0], [1], [0, 0, 1, 1], [], []>} : vector<16x16xbf16>, vector<16x128xbf16>, vector<16x128xf32> -> vector<16x128xf32>
    %88 = arith.truncf %87 : vector<16x128xf32> to vector<16x128xbf16>
    %c0_58 = arith.constant 0 : index
    %c0_59 = arith.constant 0 : index
    %89 = vector.load %arg17[%c0_58, %c0_59] : memref<16x512xbf16, #tpu.memory_space<vmem>>, vector<16x128xbf16>
    tpu.vector_store %arg17[%c0_58, %c0_59], %88 {strides = array<i32>} : memref<16x512xbf16, #tpu.memory_space<vmem>>, vector<16x128xbf16>,
    %90 = vector.extract_strided_slice %82 {offsets = [1, 0, 0], sizes = [1, 16, 16], strides = [1, 1, 1]} : vector<4x16x16xbf16> to vector<1x16x16xbf16>
    %91 = vector.shape_cast %90 : vector<1x16x16xbf16> to vector<16x16xbf16>
    %c1_60 = arith.constant 1 : index
    %c0_61 = arith.constant 0 : index
    %c0_62 = arith.constant 0 : index
    %92 = vector.load %arg16[%c1_60, %c0_61, %c0_62] : memref<4x16x128xbf16, #tpu.memory_space<vmem>>, vector<1x16x128xbf16>
    %93 = vector.shape_cast %92 : vector<1x16x128xbf16> to vector<16x128xbf16>
    %cst_63 = arith.constant dense<0.000000e+00> : vector<16x128xf32>
    %94 = tpu.matmul %91, %93, %cst_63 {dimension_numbers = #tpu.dot_dimension_numbers<[1], [0], [0], [1], [0, 0, 1, 1], [], []>} : vector<16x16xbf16>, vector<16x128xbf16>, vector<16x128xf32> -> vector<16x128xf32>
    %95 = arith.truncf %94 : vector<16x128xf32> to vector<16x128xbf16>
    %c0_64 = arith.constant 0 : index
    %c128 = arith.constant 128 : index
    %96 = vector.load %arg17[%c0_64, %c128] : memref<16x512xbf16, #tpu.memory_space<vmem>>, vector<16x128xbf16>
    tpu.vector_store %arg17[%c0_64, %c128], %95 {strides = array<i32>} : memref<16x512xbf16, #tpu.memory_space<vmem>>, vector<16x128xbf16>,
    %97 = vector.extract_strided_slice %82 {offsets = [2, 0, 0], sizes = [1, 16, 16], strides = [1, 1, 1]} : vector<4x16x16xbf16> to vector<1x16x16xbf16>
    %98 = vector.shape_cast %97 : vector<1x16x16xbf16> to vector<16x16xbf16>
    %c2_65 = arith.constant 2 : index
    %c0_66 = arith.constant 0 : index
    %c0_67 = arith.constant 0 : index
    %99 = vector.load %arg16[%c2_65, %c0_66, %c0_67] : memref<4x16x128xbf16, #tpu.memory_space<vmem>>, vector<1x16x128xbf16>
    %100 = vector.shape_cast %99 : vector<1x16x128xbf16> to vector<16x128xbf16>
    %cst_68 = arith.constant dense<0.000000e+00> : vector<16x128xf32>
    %101 = tpu.matmul %98, %100, %cst_68 {dimension_numbers = #tpu.dot_dimension_numbers<[1], [0], [0], [1], [0, 0, 1, 1], [], []>} : vector<16x16xbf16>, vector<16x128xbf16>, vector<16x128xf32> -> vector<16x128xf32>
    %102 = arith.truncf %101 : vector<16x128xf32> to vector<16x128xbf16>
    %c0_69 = arith.constant 0 : index
    %c256 = arith.constant 256 : index
    %103 = vector.load %arg17[%c0_69, %c256] : memref<16x512xbf16, #tpu.memory_space<vmem>>, vector<16x128xbf16>
    tpu.vector_store %arg17[%c0_69, %c256], %102 {strides = array<i32>} : memref<16x512xbf16, #tpu.memory_space<vmem>>, vector<16x128xbf16>,
    %104 = vector.extract_strided_slice %82 {offsets = [3, 0, 0], sizes = [1, 16, 16], strides = [1, 1, 1]} : vector<4x16x16xbf16> to vector<1x16x16xbf16>
    %105 = vector.shape_cast %104 : vector<1x16x16xbf16> to vector<16x16xbf16>
    %c3_70 = arith.constant 3 : index
    %c0_71 = arith.constant 0 : index
    %c0_72 = arith.constant 0 : index
    %106 = vector.load %arg16[%c3_70, %c0_71, %c0_72] : memref<4x16x128xbf16, #tpu.memory_space<vmem>>, vector<1x16x128xbf16>
    %107 = vector.shape_cast %106 : vector<1x16x128xbf16> to vector<16x128xbf16>
    %cst_73 = arith.constant dense<0.000000e+00> : vector<16x128xf32>
    %108 = tpu.matmul %105, %107, %cst_73 {dimension_numbers = #tpu.dot_dimension_numbers<[1], [0], [0], [1], [0, 0, 1, 1], [], []>} : vector<16x16xbf16>, vector<16x128xbf16>, vector<16x128xf32> -> vector<16x128xf32>
    %109 = arith.truncf %108 : vector<16x128xf32> to vector<16x128xbf16>
    %c0_74 = arith.constant 0 : index
    %c384 = arith.constant 384 : index
    %110 = vector.load %arg17[%c0_74, %c384] : memref<16x512xbf16, #tpu.memory_space<vmem>>, vector<16x128xbf16>
    tpu.vector_store %arg17[%c0_74, %c384], %109 {strides = array<i32>} : memref<16x512xbf16, #tpu.memory_space<vmem>>, vector<16x128xbf16>,
    %c0_75 = arith.constant 0 : index
    %c0_76 = arith.constant 0 : index
    %111 = vector.load %arg17[%c0_75, %c0_76] : memref<16x512xbf16, #tpu.memory_space<vmem>>, vector<16x512xbf16>
    %c0_77 = arith.constant 0 : index
    %c0_78 = arith.constant 0 : index
    %112 = vector.load %arg8[%c0_77, %c0_78] : memref<512x32xbf16, #tpu.memory_space<vmem>>, vector<512x32xbf16>
    %cst_79 = arith.constant dense<0.000000e+00> : vector<16x32xf32>
    %113 = tpu.matmul %111, %112, %cst_79 {dimension_numbers = #tpu.dot_dimension_numbers<[1], [0], [0], [1], [0, 0, 1, 1], [], []>} : vector<16x512xbf16>, vector<512x32xbf16>, vector<16x32xf32> -> vector<16x32xf32>
    %c0_80 = arith.constant 0 : index
    %c0_81 = arith.constant 0 : index
    %114 = vector.load %arg12[%c0_80, %c0_81] : memref<1x32xf32, #tpu.memory_space<vmem>>, vector<1x32xf32>
    %115 = vector.broadcast %114 : vector<1x32xf32> to vector<16x32xf32>
    %116 = arith.addf %113, %115 : vector<16x32xf32>
    %c0_82 = arith.constant 0 : index
    %c0_83 = arith.constant 0 : index
    %c0_84 = arith.constant 0 : index
    %117 = vector.load %arg13[%c0_82, %c0_83, %c0_84] : memref<1x16x32xf32, #tpu.memory_space<vmem>>, vector<1x16x32xf32>
    %118 = vector.shape_cast %117 : vector<1x16x32xf32> to vector<16x32xf32>
    %119 = vector.shape_cast %116 : vector<16x32xf32> to vector<1x16x32xf32>
    tpu.vector_store %arg13[%c0_82, %c0_83, %c0_84], %119 {strides = array<i32>} : memref<1x16x32xf32, #tpu.memory_space<vmem>>, vector<1x16x32xf32>,
    return
  }
  func.func @transform_0(%arg0: i32, %arg1: i32) -> (i32, i32, i32) {
    %c0_i32 = arith.constant 0 : i32
    %c0_i32_0 = arith.constant 0 : i32
    return %arg0, %arg1, %c0_i32 : i32, i32, i32
  }
  func.func @transform_1(%arg0: i32, %arg1: i32) -> (i32, i32, i32) {
    %c0_i32 = arith.constant 0 : i32
    %c0_i32_0 = arith.constant 0 : i32
    %c0_i32_1 = arith.constant 0 : i32
    return %arg0, %c0_i32, %c0_i32_0 : i32, i32, i32
  }
  func.func @transform_2(%arg0: i32, %arg1: i32) -> (i32, i32, i32) {
    %c0_i32 = arith.constant 0 : i32
    %c0_i32_0 = arith.constant 0 : i32
    %c0_i32_1 = arith.constant 0 : i32
    return %arg0, %c0_i32, %c0_i32_0 : i32, i32, i32
  }
  func.func @transform_3(%arg0: i32, %arg1: i32) -> (i32, i32) {
    %c0_i32 = arith.constant 0 : i32
    %c0_i32_0 = arith.constant 0 : i32
    %c0_i32_1 = arith.constant 0 : i32
    return %c0_i32, %c0_i32_0 : i32, i32
  }
  func.func @transform_4(%arg0: i32, %arg1: i32) -> (i32, i32) {
    %c0_i32 = arith.constant 0 : i32
    %c0_i32_0 = arith.constant 0 : i32
    %c0_i32_1 = arith.constant 0 : i32
    return %c0_i32, %c0_i32_0 : i32, i32
  }
  func.func @transform_5(%arg0: i32, %arg1: i32) -> (i32, i32) {
    %c0_i32 = arith.constant 0 : i32
    %c0_i32_0 = arith.constant 0 : i32
    %c0_i32_1 = arith.constant 0 : i32
    return %c0_i32, %c0_i32_0 : i32, i32
  }
  func.func @transform_6(%arg0: i32, %arg1: i32) -> (i32, i32) {
    %c0_i32 = arith.constant 0 : i32
    %c0_i32_0 = arith.constant 0 : i32
    %c0_i32_1 = arith.constant 0 : i32
    return %c0_i32, %c0_i32_0 : i32, i32
  }
  func.func @transform_7(%arg0: i32, %arg1: i32) -> (i32, i32) {
    %c0_i32 = arith.constant 0 : i32
    %c0_i32_0 = arith.constant 0 : i32
    %c0_i32_1 = arith.constant 0 : i32
    return %c0_i32, %c0_i32_0 : i32, i32
  }
  func.func @transform_8(%arg0: i32, %arg1: i32) -> (i32, i32) {
    %c0_i32 = arith.constant 0 : i32
    %c0_i32_0 = arith.constant 0 : i32
    %c0_i32_1 = arith.constant 0 : i32
    return %c0_i32, %c0_i32_0 : i32, i32
  }
  func.func @transform_9(%arg0: i32, %arg1: i32) -> (i32, i32) {
    %c0_i32 = arith.constant 0 : i32
    %c0_i32_0 = arith.constant 0 : i32
    %c0_i32_1 = arith.constant 0 : i32
    return %c0_i32, %c0_i32_0 : i32, i32
  }
  func.func @transform_10(%arg0: i32, %arg1: i32) -> (i32, i32) {
    %c0_i32 = arith.constant 0 : i32
    %c0_i32_0 = arith.constant 0 : i32
    %c0_i32_1 = arith.constant 0 : i32
    return %c0_i32, %c0_i32_0 : i32, i32
  }
  func.func @transform_11(%arg0: i32, %arg1: i32) -> (i32, i32, i32) {
    %c0_i32 = arith.constant 0 : i32
    %c0_i32_0 = arith.constant 0 : i32
    return %arg0, %arg1, %c0_i32 : i32, i32, i32
  }
  func.func @transform_12(%arg0: i32, %arg1: i32) -> (i32, i32, i32, i32) {
    %c0_i32 = arith.constant 0 : i32
    %c0_i32_0 = arith.constant 0 : i32
    %c0_i32_1 = arith.constant 0 : i32
    return %arg0, %c0_i32, %arg1, %c0_i32_0 : i32, i32, i32, i32
  }
}

module attributes {stable_mosaic.version = 11 : i64} {
  func.func @_mha_kernel(%arg0: i32, %arg1: i32, %arg2: memref<1x16x32xbf16, #tpu.memory_space<vmem>>, %arg3: memref<1x16x32xbf16, #tpu.memory_space<vmem>>, %arg4: memref<1x16x32xbf16, #tpu.memory_space<vmem>>, %arg5: memref<32x512xbf16, #tpu.memory_space<vmem>>, %arg6: memref<32x512xbf16, #tpu.memory_space<vmem>>, %arg7: memref<32x512xbf16, #tpu.memory_space<vmem>>, %arg8: memref<512x32xbf16, #tpu.memory_space<vmem>>, %arg9: memref<1x512xf32, #tpu.memory_space<vmem>>, %arg10: memref<1x512xf32, #tpu.memory_space<vmem>>, %arg11: memref<1x512xf32, #tpu.memory_space<vmem>>, %arg12: memref<1x32xf32, #tpu.memory_space<vmem>>, %arg13: memref<1x16x32xf32, #tpu.memory_space<vmem>>, %arg14: memref<1x4x16x16xf32, #tpu.memory_space<vmem>>, %arg15: memref<4x16x128xbf16, #tpu.memory_space<vmem>>, %arg16: memref<4x16x128xbf16, #tpu.memory_space<vmem>>, %arg17: memref<16x512xbf16, #tpu.memory_space<vmem>>) attributes {dimension_semantics = [#tpu.dimension_semantics<parallel>, #tpu.dimension_semantics<parallel>], iteration_bounds = array<i64: 2, 1>, scalar_prefetch = 0 : i64, scratch_operands = 3 : i64, tpu.core_type = #tpu.core_type<tc>, window_params = [{transform_indices = @transform_0, window_bounds = array<i64: 1, 16, 32>}, {transform_indices = @transform_1, window_bounds = array<i64: 1, 16, 32>}, {transform_indices = @transform_2, window_bounds = array<i64: 1, 16, 32>}, {pipeline_mode = #tpu.pipeline_mode<synchronous>, transform_indices = @transform_3, window_bounds = array<i64: 32, 512>}, {pipeline_mode = #tpu.pipeline_mode<synchronous>, transform_indices = @transform_4, window_bounds = array<i64: 32, 512>}, {pipeline_mode = #tpu.pipeline_mode<synchronous>, transform_indices = @transform_5, window_bounds = array<i64: 32, 512>}, {pipeline_mode = #tpu.pipeline_mode<synchronous>, transform_indices = @transform_6, window_bounds = array<i64: 512, 32>}, {pipeline_mode = #tpu.pipeline_mode<synchronous>, transform_indices = @transform_7, window_bounds = array<i64: 1, 512>}, {pipeline_mode = #tpu.pipeline_mode<synchronous>, transform_indices = @transform_8, window_bounds = array<i64: 1, 512>}, {pipeline_mode = #tpu.pipeline_mode<synchronous>, transform_indices = @transform_9, window_bounds = array<i64: 1, 512>}, {pipeline_mode = #tpu.pipeline_mode<synchronous>, transform_indices = @transform_10, window_bounds = array<i64: 1, 32>}, {transform_indices = @transform_11, window_bounds = array<i64: 1, 16, 32>}, {transform_indices = @transform_12, window_bounds = array<i64: 1, 4, 16, 16>}]} {
    %c0 = arith.constant 0 : index
    %c0_0 = arith.constant 0 : index
    %c0_1 = arith.constant 0 : index
    %0 = vector.load %arg3[%c0, %c0_0, %c0_1] : memref<1x16x32xbf16, #tpu.memory_space<vmem>>, vector<1x16x32xbf16>
    %1 = vector.shape_cast %0 : vector<1x16x32xbf16> to vector<16x32xbf16>
    %c0_2 = arith.constant 0 : index
    %c0_3 = arith.constant 0 : index
    %2 = vector.load %arg6[%c0_2, %c0_3] : memref<32x512xbf16, #tpu.memory_space<vmem>>, vector<32x512xbf16>
    %cst = arith.constant dense<0.000000e+00> : vector<16x512xf32>
    %3 = tpu.matmul %1, %2, %cst {dimension_numbers = #tpu.dot_dimension_numbers<[1], [0], [0], [1], [0, 0, 1, 1], [], []>} : vector<16x32xbf16>, vector<32x512xbf16>, vector<16x512xf32> -> vector<16x512xf32>
    %c0_4 = arith.constant 0 : index
    %c0_5 = arith.constant 0 : index
    %4 = vector.load %arg10[%c0_4, %c0_5] : memref<1x512xf32, #tpu.memory_space<vmem>>, vector<1x512xf32>
    %5 = vector.broadcast %4 : vector<1x512xf32> to vector<16x512xf32>
    %6 = arith.addf %3, %5 : vector<16x512xf32>
    %7 = arith.truncf %6 : vector<16x512xf32> to vector<16x512xbf16>
    %c0_6 = arith.constant 0 : index
    %c0_7 = arith.constant 0 : index
    %c0_8 = arith.constant 0 : index
    %8 = vector.load %arg4[%c0_6, %c0_7, %c0_8] : memref<1x16x32xbf16, #tpu.memory_space<vmem>>, vector<1x16x32xbf16>
    %9 = vector.shape_cast %8 : vector<1x16x32xbf16> to vector<16x32xbf16>
    %c0_9 = arith.constant 0 : index
    %c0_10 = arith.constant 0 : index
    %10 = vector.load %arg7[%c0_9, %c0_10] : memref<32x512xbf16, #tpu.memory_space<vmem>>, vector<32x512xbf16>
    %cst_11 = arith.constant dense<0.000000e+00> : vector<16x512xf32>
    %11 = tpu.matmul %9, %10, %cst_11 {dimension_numbers = #tpu.dot_dimension_numbers<[1], [0], [0], [1], [0, 0, 1, 1], [], []>} : vector<16x32xbf16>, vector<32x512xbf16>, vector<16x512xf32> -> vector<16x512xf32>
    %c0_12 = arith.constant 0 : index
    %c0_13 = arith.constant 0 : index
    %12 = vector.load %arg11[%c0_12, %c0_13] : memref<1x512xf32, #tpu.memory_space<vmem>>, vector<1x512xf32>
    %13 = vector.broadcast %12 : vector<1x512xf32> to vector<16x512xf32>
    %14 = arith.addf %11, %13 : vector<16x512xf32>
    %15 = arith.truncf %14 : vector<16x512xf32> to vector<16x512xbf16>
    %16 = vector.extract_strided_slice %7 {offsets = [0, 0], sizes = [16, 128], strides = [1, 1]} : vector<16x512xbf16> to vector<16x128xbf16>
    %c0_14 = arith.constant 0 : index
    %c0_15 = arith.constant 0 : index
    %c0_16 = arith.constant 0 : index
    %17 = vector.load %arg15[%c0_14, %c0_15, %c0_16] : memref<4x16x128xbf16, #tpu.memory_space<vmem>>, vector<1x16x128xbf16>
    %18 = vector.shape_cast %17 : vector<1x16x128xbf16> to vector<16x128xbf16>
    %19 = vector.shape_cast %16 : vector<16x128xbf16> to vector<1x16x128xbf16>
    tpu.vector_store %arg15[%c0_14, %c0_15, %c0_16], %19 {strides = array<i32>} : memref<4x16x128xbf16, #tpu.memory_space<vmem>>, vector<1x16x128xbf16>,
    %20 = vector.extract_strided_slice %15 {offsets = [0, 0], sizes = [16, 128], strides = [1, 1]} : vector<16x512xbf16> to vector<16x128xbf16>
    %c0_17 = arith.constant 0 : index
    %c0_18 = arith.constant 0 : index
    %c0_19 = arith.constant 0 : index
    %21 = vector.load %arg16[%c0_17, %c0_18, %c0_19] : memref<4x16x128xbf16, #tpu.memory_space<vmem>>, vector<1x16x128xbf16>
    %22 = vector.shape_cast %21 : vector<1x16x128xbf16> to vector<16x128xbf16>
    %23 = vector.shape_cast %20 : vector<16x128xbf16> to vector<1x16x128xbf16>
    tpu.vector_store %arg16[%c0_17, %c0_18, %c0_19], %23 {strides = array<i32>} : memref<4x16x128xbf16, #tpu.memory_space<vmem>>, vector<1x16x128xbf16>,
    %24 = vector.extract_strided_slice %7 {offsets = [0, 128], sizes = [16, 128], strides = [1, 1]} : vector<16x512xbf16> to vector<16x128xbf16>
    %c1 = arith.constant 1 : index
    %c0_20 = arith.constant 0 : index
    %c0_21 = arith.constant 0 : index
    %25 = vector.load %arg15[%c1, %c0_20, %c0_21] : memref<4x16x128xbf16, #tpu.memory_space<vmem>>, vector<1x16x128xbf16>
    %26 = vector.shape_cast %25 : vector<1x16x128xbf16> to vector<16x128xbf16>
    %27 = vector.shape_cast %24 : vector<16x128xbf16> to vector<1x16x128xbf16>
    tpu.vector_store %arg15[%c1, %c0_20, %c0_21], %27 {strides = array<i32>} : memref<4x16x128xbf16, #tpu.memory_space<vmem>>, vector<1x16x128xbf16>,
    %28 = vector.extract_strided_slice %15 {offsets = [0, 128], sizes = [16, 128], strides = [1, 1]} : vector<16x512xbf16> to vector<16x128xbf16>
    %c1_22 = arith.constant 1 : index
    %c0_23 = arith.constant 0 : index
    %c0_24 = arith.constant 0 : index
    %29 = vector.load %arg16[%c1_22, %c0_23, %c0_24] : memref<4x16x128xbf16, #tpu.memory_space<vmem>>, vector<1x16x128xbf16>
    %30 = vector.shape_cast %29 : vector<1x16x128xbf16> to vector<16x128xbf16>
    %31 = vector.shape_cast %28 : vector<16x128xbf16> to vector<1x16x128xbf16>
    tpu.vector_store %arg16[%c1_22, %c0_23, %c0_24], %31 {strides = array<i32>} : memref<4x16x128xbf16, #tpu.memory_space<vmem>>, vector<1x16x128xbf16>,
    %32 = vector.extract_strided_slice %7 {offsets = [0, 256], sizes = [16, 128], strides = [1, 1]} : vector<16x512xbf16> to vector<16x128xbf16>
    %c2 = arith.constant 2 : index
    %c0_25 = arith.constant 0 : index
    %c0_26 = arith.constant 0 : index
    %33 = vector.load %arg15[%c2, %c0_25, %c0_26] : memref<4x16x128xbf16, #tpu.memory_space<vmem>>, vector<1x16x128xbf16>
    %34 = vector.shape_cast %33 : vector<1x16x128xbf16> to vector<16x128xbf16>
    %35 = vector.shape_cast %32 : vector<16x128xbf16> to vector<1x16x128xbf16>
    tpu.vector_store %arg15[%c2, %c0_25, %c0_26], %35 {strides = array<i32>} : memref<4x16x128xbf16, #tpu.memory_space<vmem>>, vector<1x16x128xbf16>,
    %36 = vector.extract_strided_slice %15 {offsets = [0, 256], sizes = [16, 128], strides = [1, 1]} : vector<16x512xbf16> to vector<16x128xbf16>
    %c2_27 = arith.constant 2 : index
    %c0_28 = arith.constant 0 : index
    %c0_29 = arith.constant 0 : index
    %37 = vector.load %arg16[%c2_27, %c0_28, %c0_29] : memref<4x16x128xbf16, #tpu.memory_space<vmem>>, vector<1x16x128xbf16>
    %38 = vector.shape_cast %37 : vector<1x16x128xbf16> to vector<16x128xbf16>
    %39 = vector.shape_cast %36 : vector<16x128xbf16> to vector<1x16x128xbf16>
    tpu.vector_store %arg16[%c2_27, %c0_28, %c0_29], %39 {strides = array<i32>} : memref<4x16x128xbf16, #tpu.memory_space<vmem>>, vector<1x16x128xbf16>,
    %40 = vector.extract_strided_slice %7 {offsets = [0, 384], sizes = [16, 128], strides = [1, 1]} : vector<16x512xbf16> to vector<16x128xbf16>
    %c3 = arith.constant 3 : index
    %c0_30 = arith.constant 0 : index
    %c0_31 = arith.constant 0 : index
    %41 = vector.load %arg15[%c3, %c0_30, %c0_31] : memref<4x16x128xbf16, #tpu.memory_space<vmem>>, vector<1x16x128xbf16>
    %42 = vector.shape_cast %41 : vector<1x16x128xbf16> to vector<16x128xbf16>
    %43 = vector.shape_cast %40 : vector<16x128xbf16> to vector<1x16x128xbf16>
    tpu.vector_store %arg15[%c3, %c0_30, %c0_31], %43 {strides = array<i32>} : memref<4x16x128xbf16, #tpu.memory_space<vmem>>, vector<1x16x128xbf16>,
    %44 = vector.extract_strided_slice %15 {offsets = [0, 384], sizes = [16, 128], strides = [1, 1]} : vector<16x512xbf16> to vector<16x128xbf16>
    %c3_32 = arith.constant 3 : index
    %c0_33 = arith.constant 0 : index
    %c0_34 = arith.constant 0 : index
    %45 = vector.load %arg16[%c3_32, %c0_33, %c0_34] : memref<4x16x128xbf16, #tpu.memory_space<vmem>>, vector<1x16x128xbf16>
    %46 = vector.shape_cast %45 : vector<1x16x128xbf16> to vector<16x128xbf16>
    %47 = vector.shape_cast %44 : vector<16x128xbf16> to vector<1x16x128xbf16>
    tpu.vector_store %arg16[%c3_32, %c0_33, %c0_34], %47 {strides = array<i32>} : memref<4x16x128xbf16, #tpu.memory_space<vmem>>, vector<1x16x128xbf16>,
    %c0_35 = arith.constant 0 : index
    %c0_36 = arith.constant 0 : index
    %c0_37 = arith.constant 0 : index
    %48 = vector.load %arg2[%c0_35, %c0_36, %c0_37] : memref<1x16x32xbf16, #tpu.memory_space<vmem>>, vector<1x16x32xbf16>
    %49 = vector.shape_cast %48 : vector<1x16x32xbf16> to vector<16x32xbf16>
    %c0_38 = arith.constant 0 : index
    %c0_39 = arith.constant 0 : index
    %50 = vector.load %arg5[%c0_38, %c0_39] : memref<32x512xbf16, #tpu.memory_space<vmem>>, vector<32x512xbf16>
    %cst_40 = arith.constant dense<0.000000e+00> : vector<16x512xf32>
    %51 = tpu.matmul %49, %50, %cst_40 {dimension_numbers = #tpu.dot_dimension_numbers<[1], [0], [0], [1], [0, 0, 1, 1], [], []>} : vector<16x32xbf16>, vector<32x512xbf16>, vector<16x512xf32> -> vector<16x512xf32>
    %c0_41 = arith.constant 0 : index
    %c0_42 = arith.constant 0 : index
    %52 = vector.load %arg9[%c0_41, %c0_42] : memref<1x512xf32, #tpu.memory_space<vmem>>, vector<1x512xf32>
    %53 = vector.broadcast %52 : vector<1x512xf32> to vector<16x512xf32>
    %54 = arith.addf %51, %53 : vector<16x512xf32>
    %cst_43 = arith.constant 0.353553385 : f32
    %55 = vector.broadcast %cst_43 : f32 to vector<16x512xf32>
    %56 = arith.mulf %54, %55 : vector<16x512xf32>
    %57 = arith.truncf %56 : vector<16x512xf32> to vector<16x512xbf16>
    %58 = vector.extract_strided_slice %57 {offsets = [0, 0], sizes = [16, 128], strides = [1, 1]} : vector<16x512xbf16> to vector<16x128xbf16>
    %59 = vector.extract_strided_slice %57 {offsets = [0, 128], sizes = [16, 128], strides = [1, 1]} : vector<16x512xbf16> to vector<16x128xbf16>
    %60 = vector.extract_strided_slice %57 {offsets = [0, 256], sizes = [16, 128], strides = [1, 1]} : vector<16x512xbf16> to vector<16x128xbf16>
    %61 = vector.extract_strided_slice %57 {offsets = [0, 384], sizes = [16, 128], strides = [1, 1]} : vector<16x512xbf16> to vector<16x128xbf16>
    %62 = vector.shape_cast %58 : vector<16x128xbf16> to vector<1x16x128xbf16>
    %63 = vector.shape_cast %59 : vector<16x128xbf16> to vector<1x16x128xbf16>
    %64 = vector.shape_cast %60 : vector<16x128xbf16> to vector<1x16x128xbf16>
    %65 = vector.shape_cast %61 : vector<16x128xbf16> to vector<1x16x128xbf16>
    %66 = tpu.concatenate %62, %63, %64, %65 in 0 : vector<1x16x128xbf16>, vector<1x16x128xbf16>, vector<1x16x128xbf16>, vector<1x16x128xbf16> -> vector<4x16x128xbf16>
    %c0_44 = arith.constant 0 : index
    %c0_45 = arith.constant 0 : index
    %c0_46 = arith.constant 0 : index
    %67 = vector.load %arg15[%c0_44, %c0_45, %c0_46] : memref<4x16x128xbf16, #tpu.memory_space<vmem>>, vector<4x16x128xbf16>
    "tpu.trace_start"() <{level = 10 : i32, message = "hqd,hkd->hqk"}> : () -> ()
    %cst_47 = arith.constant dense<0.000000e+00> : vector<4x16x16xf32>
    %68 = tpu.matmul %66, %67, %cst_47 {dimension_numbers = #tpu.dot_dimension_numbers<[2], [2], [1], [1], [0, 0, 0, 1, 1, 1], [0], [0]>} : vector<4x16x128xbf16>, vector<4x16x128xbf16>, vector<4x16x16xf32> -> vector<4x16x16xf32>
    "tpu.trace_stop"() : () -> ()
    %cst_48 = arith.constant dense<0xFF800000> : vector<4x16xf32>
    %69 = vector.multi_reduction <maximumf>, %68, %cst_48 [2] : vector<4x16x16xf32> to vector<4x16xf32>
    %70 = vector.shape_cast %69 : vector<4x16xf32> to vector<4x16x1xf32>
    %71 = vector.broadcast %70 : vector<4x16x1xf32> to vector<4x16x16xf32>
    %72 = arith.subf %68, %71 : vector<4x16x16xf32>
    %73 = math.exp %72 : vector<4x16x16xf32>
    %cst_49 = arith.constant dense<0.000000e+00> : vector<4x16xf32>
    %74 = vector.multi_reduction <add>, %73, %cst_49 [2] : vector<4x16x16xf32> to vector<4x16xf32>
    %75 = vector.shape_cast %74 : vector<4x16xf32> to vector<4x16x1xf32>
    %76 = tpu.reciprocal %75 {approx = true} : vector<4x16x1xf32> -> vector<4x16x1xf32>
    %77 = vector.broadcast %76 : vector<4x16x1xf32> to vector<4x16x16xf32>
    %78 = arith.mulf %73, %77 : vector<4x16x16xf32>
    %c0_50 = arith.constant 0 : index
    %c0_51 = arith.constant 0 : index
    %c0_52 = arith.constant 0 : index
    %c0_53 = arith.constant 0 : index
    %79 = vector.load %arg14[%c0_50, %c0_51, %c0_52, %c0_53] : memref<1x4x16x16xf32, #tpu.memory_space<vmem>>, vector<1x4x16x16xf32>
    %80 = vector.shape_cast %79 : vector<1x4x16x16xf32> to vector<4x16x16xf32>
    %81 = vector.shape_cast %78 : vector<4x16x16xf32> to vector<1x4x16x16xf32>
    tpu.vector_store %arg14[%c0_50, %c0_51, %c0_52, %c0_53], %81 {strides = array<i32>} : memref<1x4x16x16xf32, #tpu.memory_space<vmem>>, vector<1x4x16x16xf32>,
    %82 = arith.truncf %78 : vector<4x16x16xf32> to vector<4x16x16xbf16>
    %83 = vector.extract_strided_slice %82 {offsets = [0, 0, 0], sizes = [1, 16, 16], strides = [1, 1, 1]} : vector<4x16x16xbf16> to vector<1x16x16xbf16>
    %84 = vector.shape_cast %83 : vector<1x16x16xbf16> to vector<16x16xbf16>
    %c0_54 = arith.constant 0 : index
    %c0_55 = arith.constant 0 : index
    %c0_56 = arith.constant 0 : index
    %85 = vector.load %arg16[%c0_54, %c0_55, %c0_56] : memref<4x16x128xbf16, #tpu.memory_space<vmem>>, vector<1x16x128xbf16>
    %86 = vector.shape_cast %85 : vector<1x16x128xbf16> to vector<16x128xbf16>
    %cst_57 = arith.constant dense<0.000000e+00> : vector<16x128xf32>
    %87 = tpu.matmul %84, %86, %cst_57 {dimension_numbers = #tpu.dot_dimension_numbers<[1], [0], [0], [1], [0, 0, 1, 1], [], []>} : vector<16x16xbf16>, vector<16x128xbf16>, vector<16x128xf32> -> vector<16x128xf32>
    %88 = arith.truncf %87 : vector<16x128xf32> to vector<16x128xbf16>
    %c0_58 = arith.constant 0 : index
    %c0_59 = arith.constant 0 : index
    %89 = vector.load %arg17[%c0_58, %c0_59] : memref<16x512xbf16, #tpu.memory_space<vmem>>, vector<16x128xbf16>
    tpu.vector_store %arg17[%c0_58, %c0_59], %88 {strides = array<i32>} : memref<16x512xbf16, #tpu.memory_space<vmem>>, vector<16x128xbf16>,
    %90 = vector.extract_strided_slice %82 {offsets = [1, 0, 0], sizes = [1, 16, 16], strides = [1, 1, 1]} : vector<4x16x16xbf16> to vector<1x16x16xbf16>
    %91 = vector.shape_cast %90 : vector<1x16x16xbf16> to vector<16x16xbf16>
    %c1_60 = arith.constant 1 : index
    %c0_61 = arith.constant 0 : index
    %c0_62 = arith.constant 0 : index
    %92 = vector.load %arg16[%c1_60, %c0_61, %c0_62] : memref<4x16x128xbf16, #tpu.memory_space<vmem>>, vector<1x16x128xbf16>
    %93 = vector.shape_cast %92 : vector<1x16x128xbf16> to vector<16x128xbf16>
    %cst_63 = arith.constant dense<0.000000e+00> : vector<16x128xf32>
    %94 = tpu.matmul %91, %93, %cst_63 {dimension_numbers = #tpu.dot_dimension_numbers<[1], [0], [0], [1], [0, 0, 1, 1], [], []>} : vector<16x16xbf16>, vector<16x128xbf16>, vector<16x128xf32> -> vector<16x128xf32>
    %95 = arith.truncf %94 : vector<16x128xf32> to vector<16x128xbf16>
    %c0_64 = arith.constant 0 : index
    %c128 = arith.constant 128 : index
    %96 = vector.load %arg17[%c0_64, %c128] : memref<16x512xbf16, #tpu.memory_space<vmem>>, vector<16x128xbf16>
    tpu.vector_store %arg17[%c0_64, %c128], %95 {strides = array<i32>} : memref<16x512xbf16, #tpu.memory_space<vmem>>, vector<16x128xbf16>,
    %97 = vector.extract_strided_slice %82 {offsets = [2, 0, 0], sizes = [1, 16, 16], strides = [1, 1, 1]} : vector<4x16x16xbf16> to vector<1x16x16xbf16>
    %98 = vector.shape_cast %97 : vector<1x16x16xbf16> to vector<16x16xbf16>
    %c2_65 = arith.constant 2 : index
    %c0_66 = arith.constant 0 : index
    %c0_67 = arith.constant 0 : index
    %99 = vector.load %arg16[%c2_65, %c0_66, %c0_67] : memref<4x16x128xbf16, #tpu.memory_space<vmem>>, vector<1x16x128xbf16>
    %100 = vector.shape_cast %99 : vector<1x16x128xbf16> to vector<16x128xbf16>
    %cst_68 = arith.constant dense<0.000000e+00> : vector<16x128xf32>
    %101 = tpu.matmul %98, %100, %cst_68 {dimension_numbers = #tpu.dot_dimension_numbers<[1], [0], [0], [1], [0, 0, 1, 1], [], []>} : vector<16x16xbf16>, vector<16x128xbf16>, vector<16x128xf32> -> vector<16x128xf32>
    %102 = arith.truncf %101 : vector<16x128xf32> to vector<16x128xbf16>
    %c0_69 = arith.constant 0 : index
    %c256 = arith.constant 256 : index
    %103 = vector.load %arg17[%c0_69, %c256] : memref<16x512xbf16, #tpu.memory_space<vmem>>, vector<16x128xbf16>
    tpu.vector_store %arg17[%c0_69, %c256], %102 {strides = array<i32>} : memref<16x512xbf16, #tpu.memory_space<vmem>>, vector<16x128xbf16>,
    %104 = vector.extract_strided_slice %82 {offsets = [3, 0, 0], sizes = [1, 16, 16], strides = [1, 1, 1]} : vector<4x16x16xbf16> to vector<1x16x16xbf16>
    %105 = vector.shape_cast %104 : vector<1x16x16xbf16> to vector<16x16xbf16>
    %c3_70 = arith.constant 3 : index
    %c0_71 = arith.constant 0 : index
    %c0_72 = arith.constant 0 : index
    %106 = vector.load %arg16[%c3_70, %c0_71, %c0_72] : memref<4x16x128xbf16, #tpu.memory_space<vmem>>, vector<1x16x128xbf16>
    %107 = vector.shape_cast %106 : vector<1x16x128xbf16> to vector<16x128xbf16>
    %cst_73 = arith.constant dense<0.000000e+00> : vector<16x128xf32>
    %108 = tpu.matmul %105, %107, %cst_73 {dimension_numbers = #tpu.dot_dimension_numbers<[1], [0], [0], [1], [0, 0, 1, 1], [], []>} : vector<16x16xbf16>, vector<16x128xbf16>, vector<16x128xf32> -> vector<16x128xf32>
    %109 = arith.truncf %108 : vector<16x128xf32> to vector<16x128xbf16>
    %c0_74 = arith.constant 0 : index
    %c384 = arith.constant 384 : index
    %110 = vector.load %arg17[%c0_74, %c384] : memref<16x512xbf16, #tpu.memory_space<vmem>>, vector<16x128xbf16>
    tpu.vector_store %arg17[%c0_74, %c384], %109 {strides = array<i32>} : memref<16x512xbf16, #tpu.memory_space<vmem>>, vector<16x128xbf16>,
    %c0_75 = arith.constant 0 : index
    %c0_76 = arith.constant 0 : index
    %111 = vector.load %arg17[%c0_75, %c0_76] : memref<16x512xbf16, #tpu.memory_space<vmem>>, vector<16x512xbf16>
    %c0_77 = arith.constant 0 : index
    %c0_78 = arith.constant 0 : index
    %112 = vector.load %arg8[%c0_77, %c0_78] : memref<512x32xbf16, #tpu.memory_space<vmem>>, vector<512x32xbf16>
    %cst_79 = arith.constant dense<0.000000e+00> : vector<16x32xf32>
    %113 = tpu.matmul %111, %112, %cst_79 {dimension_numbers = #tpu.dot_dimension_numbers<[1], [0], [0], [1], [0, 0, 1, 1], [], []>} : vector<16x512xbf16>, vector<512x32xbf16>, vector<16x32xf32> -> vector<16x32xf32>
    %c0_80 = arith.constant 0 : index
    %c0_81 = arith.constant 0 : index
    %114 = vector.load %arg12[%c0_80, %c0_81] : memref<1x32xf32, #tpu.memory_space<vmem>>, vector<1x32xf32>
    %115 = vector.broadcast %114 : vector<1x32xf32> to vector<16x32xf32>
    %116 = arith.addf %113, %115 : vector<16x32xf32>
    %c0_82 = arith.constant 0 : index
    %c0_83 = arith.constant 0 : index
    %c0_84 = arith.constant 0 : index
    %117 = vector.load %arg13[%c0_82, %c0_83, %c0_84] : memref<1x16x32xf32, #tpu.memory_space<vmem>>, vector<1x16x32xf32>
    %118 = vector.shape_cast %117 : vector<1x16x32xf32> to vector<16x32xf32>
    %119 = vector.shape_cast %116 : vector<16x32xf32> to vector<1x16x32xf32>
    tpu.vector_store %arg13[%c0_82, %c0_83, %c0_84], %119 {strides = array<i32>} : memref<1x16x32xf32, #tpu.memory_space<vmem>>, vector<1x16x32xf32>,
    return
  }
  func.func @transform_0(%arg0: i32, %arg1: i32) -> (i32, i32, i32) {
    %c0_i32 = arith.constant 0 : i32
    %c0_i32_0 = arith.constant 0 : i32
    return %arg0, %arg1, %c0_i32 : i32, i32, i32
  }
  func.func @transform_1(%arg0: i32, %arg1: i32) -> (i32, i32, i32) {
    %c0_i32 = arith.constant 0 : i32
    %c0_i32_0 = arith.constant 0 : i32
    %c0_i32_1 = arith.constant 0 : i32
    return %arg0, %c0_i32, %c0_i32_0 : i32, i32, i32
  }
  func.func @transform_2(%arg0: i32, %arg1: i32) -> (i32, i32, i32) {
    %c0_i32 = arith.constant 0 : i32
    %c0_i32_0 = arith.constant 0 : i32
    %c0_i32_1 = arith.constant 0 : i32
    return %arg0, %c0_i32, %c0_i32_0 : i32, i32, i32
  }
  func.func @transform_3(%arg0: i32, %arg1: i32) -> (i32, i32) {
    %c0_i32 = arith.constant 0 : i32
    %c0_i32_0 = arith.constant 0 : i32
    %c0_i32_1 = arith.constant 0 : i32
    return %c0_i32, %c0_i32_0 : i32, i32
  }
  func.func @transform_4(%arg0: i32, %arg1: i32) -> (i32, i32) {
    %c0_i32 = arith.constant 0 : i32
    %c0_i32_0 = arith.constant 0 : i32
    %c0_i32_1 = arith.constant 0 : i32
    return %c0_i32, %c0_i32_0 : i32, i32
  }
  func.func @transform_5(%arg0: i32, %arg1: i32) -> (i32, i32) {
    %c0_i32 = arith.constant 0 : i32
    %c0_i32_0 = arith.constant 0 : i32
    %c0_i32_1 = arith.constant 0 : i32
    return %c0_i32, %c0_i32_0 : i32, i32
  }
  func.func @transform_6(%arg0: i32, %arg1: i32) -> (i32, i32) {
    %c0_i32 = arith.constant 0 : i32
    %c0_i32_0 = arith.constant 0 : i32
    %c0_i32_1 = arith.constant 0 : i32
    return %c0_i32, %c0_i32_0 : i32, i32
  }
  func.func @transform_7(%arg0: i32, %arg1: i32) -> (i32, i32) {
    %c0_i32 = arith.constant 0 : i32
    %c0_i32_0 = arith.constant 0 : i32
    %c0_i32_1 = arith.constant 0 : i32
    return %c0_i32, %c0_i32_0 : i32, i32
  }
  func.func @transform_8(%arg0: i32, %arg1: i32) -> (i32, i32) {
    %c0_i32 = arith.constant 0 : i32
    %c0_i32_0 = arith.constant 0 : i32
    %c0_i32_1 = arith.constant 0 : i32
    return %c0_i32, %c0_i32_0 : i32, i32
  }
  func.func @transform_9(%arg0: i32, %arg1: i32) -> (i32, i32) {
    %c0_i32 = arith.constant 0 : i32
    %c0_i32_0 = arith.constant 0 : i32
    %c0_i32_1 = arith.constant 0 : i32
    return %c0_i32, %c0_i32_0 : i32, i32
  }
  func.func @transform_10(%arg0: i32, %arg1: i32) -> (i32, i32) {
    %c0_i32 = arith.constant 0 : i32
    %c0_i32_0 = arith.constant 0 : i32
    %c0_i32_1 = arith.constant 0 : i32
    return %c0_i32, %c0_i32_0 : i32, i32
  }
  func.func @transform_11(%arg0: i32, %arg1: i32) -> (i32, i32, i32) {
    %c0_i32 = arith.constant 0 : i32
    %c0_i32_0 = arith.constant 0 : i32
    return %arg0, %arg1, %c0_i32 : i32, i32, i32
  }
  func.func @transform_12(%arg0: i32, %arg1: i32) -> (i32, i32, i32, i32) {
    %c0_i32 = arith.constant 0 : i32
    %c0_i32_0 = arith.constant 0 : i32
    %c0_i32_1 = arith.constant 0 : i32
    return %arg0, %c0_i32, %arg1, %c0_i32_0 : i32, i32, i32, i32
  }
}

</mosaic_0001>

<bundles_post_ra>
// kernel: tpu_custom_call.1
= control target key start
LH: loop header
LB: loop body
LE: loop exit
PB: predicated region body
PF: predicated region fallthrough
CT: control target
= control target key end

     0   :  { %s3279_s0 = inlined_call_operand.vmem [shape: bf16[2,16,32], index: 0, kind: input, shape index: {}]   ;;  %s3280_s1 = inlined_call_operand.vmem [shape: bf16[2,16,32], index: 1, kind: input, shape index: {}]   ;;  %s3281_s2 = inlined_call_operand.vmem [shape: bf16[2,16,32], index: 2, kind: input, shape index: {}]   ;;  %s3282_s3 = inlined_call_operand.vmem [shape: bf16[32,512], index: 3, kind: input, shape index: {}]   ;;  %s3283_s4 = inlined_call_operand.vmem [shape: bf16[32,512], index: 4, kind: input, shape index: {}]   ;;  %s3284_s5 = inlined_call_operand.vmem [shape: bf16[32,512], index: 5, kind: input, shape index: {}]   ;;  %s3285_s6 = inlined_call_operand.vmem [shape: bf16[512,32], index: 6, kind: input, shape index: {}]   ;;  %s3286_s7 = inlined_call_operand.vmem [shape: f32[1,512], index: 7, kind: input, shape index: {}]   ;;  %s3287_s8 = inlined_call_operand.vmem [shape: f32[1,512], index: 8, kind: input, shape index: {}]   ;;  %s3288_s9 = inlined_call_operand.vmem [shape: f32[1,512], index: 9, kind: input, shape index: {}]   ;;  %s3289_s10 = inlined_call_operand.vmem [shape: f32[1,32], index: 10, kind: input, shape index: {}]   ;;  %s3290_s11 = inlined_call_operand.hbm [shape: f32[2,16,32], index: 11, kind: output, shape index: {0}]   ;;  %s3291_s12 = inlined_call_operand.hbm [shape: f32[2,4,16,16], index: 12, kind: output, shape index: {1}]  }
   0x1   :  { %3295 = sst [smem:[#allocation14_spill]] %s3280_s1 }
   0x2   :  { %18 = vsyncpa [#allocation6], 0 }
   0x3   :  { %20 = vsyncpa [#allocation6 + $0x1], 0 }
   0x4   :  { %21 = vsyncpa [#allocation8], 0 }
   0x5   :  { %23 = vsyncpa [#allocation8 + $0x1], 0  ;;  %s2854_s21 = smov 0   ;;  %s2856_s22 = smov 0  }
   0x6   :  { %s2858_s23 = smov 0   ;;  %s2860_s24 = smov 0  }
   0x7   :  { %s2862_s25 = smov 0   ;;  %s2864_s26 = smov 0  }
   0x8 LB: > { %3296 = sst [smem:[#allocation11_spill]] %s2776_s25  ;;  %s2188_s27 = sadd.s32 4294967295, %s2780_s26   ;;  %s2780_s26 = sphi %s2864_s26, %s29_s26   ;;  %s2776_s25 = sphi %s2862_s25, %s3306_s25   ;;  %s2772_s24 = sphi %s2860_s24, %s3305_s24   ;;  %s2768_s23 = sphi %s2858_s23, %s3309_s23   ;;  %s2764_s22 = sphi %s2856_s22, %s3308_s22   ;;  %s2760_s21 = sphi %s2854_s21, %s3307_s21  }
   0x9   : > { %s2189_s28 = sadd.s32 4294967294, %s2780_s26   ;;  %s41_s29 = sadd.s32 1, %s2776_s25 }
   0xa   : > { %s298_s30 = sadd.s32 1, %s2768_s23  ;;  %p43_p0 = scmp.ge.s32.totalorder %s41_s29, 2 }
   0xb   : > { %p308_p1 = scmp.ne.s32.totalorder %s2768_s23, %s2764_s22  ;;  %p309_p2 = scmp.eq.s32.totalorder %s2188_s27, 1 }
   0xc   : > { %p314_p3 = scmp.ne.s32.totalorder %s2764_s22, %s2760_s21  ;;  %s3311_s29 = smov (%p43_p0, %s41_s29), 0 }
   0xd   : > { %3297 = sst [smem:[#allocation12_spill]] %s3311_s29  ;;  %p2894_p4 = por %p309_p2, %p308_p1 }
   0xe   : > { %p315_p5 = scmp.eq.s32.totalorder %s2189_s28, 1  ;;  %s293_s14 = ssub.s32 %s2776_s25, %s3311_s29 }
   0xf   : > { %p2192_p6 = scmp.ge.s32.totalorder %s2780_s26, 1  ;;  %p296_p7 = scmp.eq.s32.totalorder %s293_s14, 0 }
  0x10   : > { %p2901_p8 = por %p315_p5, %p314_p3  ;;  %p414_p9 = scmp.lt.s32.totalorder %s2780_s26, 3 }
  0x11   : > { %s2907_s16 = scalar_select %p296_p7, %s2768_s23, %s298_s30  }
  0x12   : > { %p415_p10 = pnand %p2192_p6, %p414_p9 }
  0x13   : > { %3300 = sst [smem:[#allocation13_spill]] %s2907_s16  ;;  %p476_p11 = scmp.lt.s32.totalorder (!%p415_p10), %s2772_s24, 1 }
  0x14   : > { %418 = sbr.rel (%p415_p10) target bundleno = 1203 (0x4b3), region = 64  ;;  %s3301_s1 = sld [smem:[#allocation14_spill]] (!%p415_p10) }
  0x15   : > { %s3059_s16 = sand.u32 (!%p415_p10), 1, %s2764_s22   ;;  %s2785_s14 = smov (!%p415_p10), [#allocation7]  }
  0x16   : > { %s2194_s19 = sshll.u32 (!%p415_p10), %s3059_s16, 6  ;;  %s2678_s17 = sshll.u32 (!%p415_p10), %s2785_s14, 4  ;;  %s2679_s17 = int_to_ptr.vmem [resolvable:$false] %s2678_s17 }
  0x17   : > { %s3062_s20 = scalar_lea.vmem (!%p415_p10), [#allocation7], %s2194_s19 }
  0x19   : > { %v2557_v0 = vld [vmem:[%s3283_s4 + $0x24] ss:$16 sps:$4 sm:$0xff]   ;;  %v2559_v1 = vld [vmem:[%s3283_s4 + $0x20] ss:$16 sps:$4 sm:$0xff]   ;;  %v2782_v2 = vmov 0   ;;  %s477_s30 = scalar_select %p476_p11, %s2772_s24, 1  ;;  %v510_v29 = vlaneseq }
  0x1a   : > { %611 = vmatprep.mubr.bf16.mxu0 %v2782_v2  ;;  %654 = vmatprep.mubr.bf16.mxu1 %v2782_v2  ;;  %v2560_v3 = vld [vmem:[%s3283_s4 + $0x2c] ss:$16 sps:$4 sm:$0xff]   ;;  %v2562_v4 = vld [vmem:[%s3283_s4 + $0x4] ss:$16 sps:$4 sm:$0xff]   ;;  %v2564_v5 = vld [vmem:[%s3283_s4 + $0x28] ss:$16 sps:$4 sm:$0xff]  }
  0x1b   : > { %591 = vmatprep.subr.bf16.mxu0 %v2557_v0  ;;  %v2565_v6 = vld [vmem:[%s3283_s4] ss:$16 sps:$4 sm:$0xff]   ;;  %634 = vmatprep.subr.bf16.mxu1 %v2560_v3  ;;  %v2566_v7 = vld [vmem:[%s3283_s4 + $0xc] ss:$16 sps:$4 sm:$0xff]   ;;  %s2932_s27 = sshll.u32 %s477_s30, 3  ;;  %vm575_vm0 = vcmask 261120  }
  0x1c   : > { %592 = vmatpush1.bf16.msra.mxu0 %v2559_v1  ;;  %635 = vmatpush1.bf16.msra.mxu1 %v2564_v5  ;;  %s489_s29 = scalar_lea.vmem %s3301_s1, %s2932_s27  ;;  %v2569_v8 = vld [vmem:[%s3283_s4 + $0x8] ss:$16 sps:$4 sm:$0xff]   ;;  %v2570_v10 = vld [vmem:[%s3284_s5 + $0x20] ss:$16 sps:$4 sm:$0xff]   ;;  %v2572_v11 = vld [vmem:[%s3284_s5 + $0x24] ss:$16 sps:$4 sm:$0xff]   ;;  %s494_s30 = scalar_lea.vmem %s3281_s2, %s2932_s27 }
  0x1d   : > { %593 = vmatprep.subr.bf16.mxu0 %v2562_v4  ;;  %636 = vmatprep.subr.bf16.mxu1 %v2566_v7  ;;  %v2568_v9 = vld [vmem:[%s489_s29] sm:$0xff]   ;;  %v2575_v12 = vld [vmem:[%s3284_s5 + $0x2c] ss:$16 sps:$4 sm:$0xff]   ;;  %v2573_v13 = vld [vmem:[%s3284_s5 + $0x28] ss:$16 sps:$4 sm:$0xff]   ;;  %s483_s1 = scalar_lea.vmem %s3279_s0, %s2932_s27  ;;  %v2783_v28 = vmov 0.0  }
  0x1e   : > { %v2578_v14 = vld [vmem:[%s3284_s5 + $0x4] ss:$16 sps:$4 sm:$0xff]   ;;  %v2576_v15 = vld [vmem:[%s3284_s5] ss:$16 sps:$4 sm:$0xff]   ;;  %v2581_v16 = vld [vmem:[%s3284_s5 + $0xc] ss:$16 sps:$4 sm:$0xff]  }
  0x1f   : > { %v2579_v17 = vld [vmem:[%s3284_s5 + $0x8] ss:$16 sps:$4 sm:$0xff]   ;;  %v2582_v18 = vld [vmem:[%s494_s30] sm:$0xff]   ;;  %v2588_v21 = vld [vmem:[%s3282_s3 + $0x2c] ss:$16 sps:$4 sm:$0xff]   ;;  %vm2784_vm1 = vmmov 0  }
  0x20   : > { %594 = vmatpush1.bf16.msra.mxu0 %v2565_v6  ;;  %637 = vmatpush1.bf16.msra.mxu1 %v2569_v8  ;;  %v2585_v19 = vld [vmem:[%s3282_s3 + $0x24] ss:$16 sps:$4 sm:$0xff]   ;;  %v2583_v20 = vld [vmem:[%s3282_s3 + $0x20] ss:$16 sps:$4 sm:$0xff]   ;;  %v2586_v23 = vld [vmem:[%s3282_s3 + $0x28] ss:$16 sps:$4 sm:$0xff]  }
  0x21   : > { %761 = vmatprep.subr.bf16.mxu0 %v2572_v11  ;;  %804 = vmatprep.subr.bf16.mxu1 %v2575_v12  ;;  %v2591_v22 = vld [vmem:[%s3282_s3 + $0x4] ss:$16 sps:$4 sm:$0xff]   ;;  %v2589_v24 = vld [vmem:[%s3282_s3] ss:$16 sps:$4 sm:$0xff]   ;;  %v2594_v25 = vld [vmem:[%s3282_s3 + $0xc] ss:$16 sps:$4 sm:$0xff]  }
  0x22   : > { %v2592_v26 = vld [vmem:[%s3282_s3 + $0x8] ss:$16 sps:$4 sm:$0xff]   ;;  %v2595_v27 = vld [vmem:[%s483_s1] sm:$0xff]   ;;  %v511_v30 = vshrl.u32 %v510_v29, 7  ;;  %vm1291_vm2 = vcmask 130048   ;;  %s2050_s27 = sshll.u32 %s3062_s20, 4  ;;  %s3185_s27 = int_to_ptr.vmem [resolvable:$true] %s2050_s27 }
  0x23   : > { %2210 = vmatmul.mubr.msk.bf16.vlgmr.msra.gmra.mxu0 %vm575_vm0, %v2568_v9  ;;  %2211 = vmatmul.mubr.msk.bf16.vlgmr.msra.gmra.mxu1 %vm575_vm0, %v2568_v9  ;;  %v508_v33 = vld [vmem:[%s3287_s8] sm:$0xf]  ;;  %s2343_s30 = sshll.u32 %s2772_s24, 10  ;;  %s2674_s28 = scalar_lea.vmem %s3185_s27, 1024 }
  0x24   : > { %762 = vmatpush1.bf16.msra.mxu0 %v2570_v10  ;;  %781 = vmatprep.mubr.bf16.mxu0 %v2782_v2  ;;  %v512_v31 = vsub.s32 0, %v511_v30  ;;  %v3009_v32 = vsub.s32 2, %v511_v30  ;;  %v516_v34 = vsub.s32 1, %v511_v30  ;;  %v3014_v35 = vsub.s32 3, %v511_v30  ;;  %v679_v48 = vld [vmem:[%s3288_s9] sm:$0xf]  ;;  %s3191_s25 = scalar_lea.hbm %s3291_s12, %s2343_s30  ;;  %p2675_p12 = scmp.ne.s32.totalorder %s3185_s27, %s2674_s28 }
  0x25   : > { %763 = vmatprep.subr.bf16.mxu0 %v2578_v14  ;;  %805 = vmatpush1.bf16.msra.mxu1 %v2573_v13  ;;  %v927_v4 = vld [vmem:[%s3286_s7] sm:$0xf]  ;;  %p2681_p1 = scmp.lt.s32.totalorder %s3185_s27, %s2679_s17 }
  0x26   : > { %824 = vmatprep.mubr.bf16.mxu1 %v2782_v2  ;;  %806 = vmatprep.subr.bf16.mxu1 %v2581_v16  ;;  %v513_v37 = vrot.slane %v508_v33, %v512_v31  ;;  %v521_v38 = vrot.slane %v508_v33, %v3009_v32  ;;  %v517_v39 = vrot.slane %v508_v33, %v516_v34  ;;  %p2676_p13 = pnand %p2675_p12, %p2894_p4 }
  0x27   : > { %v525_v42 = vrot.slane %v508_v33, %v3014_v35  ;;  %v684_v56 = vrot.slane %v679_v48, %v512_v31  ;;  %v692_v62 = vrot.slane %v679_v48, %v3009_v32  ;;  %v688_v63 = vrot.slane %v679_v48, %v516_v34 }
  0x28   : > { %764 = vmatpush1.bf16.msra.mxu0 %v2576_v15  ;;  %v696_v3 = vrot.slane %v679_v48, %v3014_v35  ;;  %v932_v13 = vrot.slane %v927_v4, %v512_v31  ;;  %v940_v31 = vrot.slane %v927_v4, %v3009_v32  ;;  %p2677_p0 = pneg %p2676_p13 }
  0x29   : > { %1009 = vmatprep.subr.bf16.mxu0 %v2585_v19  ;;  %807 = vmatpush1.bf16.msra.mxu1 %v2579_v17 }
  0x2a   : > { %1052 = vmatprep.subr.bf16.mxu1 %v2588_v21 }
  0x2b   : > { %2221 = vmatmul.mubr.msk.bf16.vlgmr.msra.gmra.mxu0 %vm575_vm0, %v2582_v18 }
  0x2c   : > { %1010 = vmatpush1.bf16.msra.mxu0 %v2583_v20  ;;  %1029 = vmatprep.mubr.bf16.mxu0 %v2782_v2 }
  0x2d   : > { %2222 = vmatmul.mubr.msk.bf16.vlgmr.msra.gmra.mxu1 %vm575_vm0, %v2582_v18  ;;  %1011 = vmatprep.subr.bf16.mxu0 %v2591_v22 }
  0x2e   : > { %1053 = vmatpush1.bf16.msra.mxu1 %v2586_v23  ;;  %1072 = vmatprep.mubr.bf16.mxu1 %v2782_v2 }
  0x2f   : > { %1054 = vmatprep.subr.bf16.mxu1 %v2594_v25 }
  0x30   : > { %1012 = vmatpush1.bf16.msra.mxu0 %v2589_v24  ;;  %v936_v24 = vrot.slane %v927_v4, %v516_v34 }
  0x31   : > { %2444 = vmatprep.subr.bf16.mxu0 %v2783_v28 }
  0x32   : > { %1055 = vmatpush1.bf16.msra.mxu1 %v2592_v26 }
  0x33   : > { %2248 = vmatmul.mubr.msk.bf16.vlgmr.msra.gmra.mxu0 %vm575_vm0, %v2595_v27  ;;  %2450 = vmatprep.subr.bf16.mxu1 %v2783_v28 }
  0x34   : > { %2446 = vmatprep.mubr.msk.bf16.mxu0 %vm2784_vm1, %v2783_v28 }
  0x35   : > { %2249 = vmatmul.mubr.msk.bf16.vlgmr.msra.gmra.mxu1 %vm575_vm0, %v2595_v27 }
  0x36   : > { %2452 = vmatprep.mubr.msk.bf16.mxu1 %vm2784_vm1, %v2783_v28 }
  0xe3   : > { %v613_v36 = vpop.f32.mrf.mxu0  ;;  %v656_v41 = vpop.f32.mrf.mxu1 }
  0xe4   : > { %v614_v45 = vadd.f32 %v613_v36, %v513_v37  ;;  %v657_v46 = vadd.f32 %v656_v41, %v521_v38 }
  0xe5   : > { %v615_v40 = vpop.f32.mrf.mxu0  ;;  %v658_v44 = vpop.f32.mrf.mxu1 }
  0xe6   : > { %v616_v49 = vadd.f32 %v615_v40, %v517_v39  ;;  %v659_v53 = vadd.f32 %v658_v44, %v525_v42 }
  0xe7   : > { %v617_v43 = vpop.f32.mrf.mxu0  ;;  %v660_v51 = vpop.f32.mrf.mxu1 }
  0xe8   : > { %v618_v47 = vadd.f32 %v617_v43, %v513_v37  ;;  %v661_v55 = vadd.f32 %v660_v51, %v521_v38 }
  0xe9   : > { %v619_v50 = vpop.f32.mrf.mxu0  ;;  %v662_v58 = vpop.f32.mrf.mxu1 }
  0xea   : > { %v2347_v52 = vpack.c.bf16 %v618_v47, %v614_v45  ;;  %v620_v54 = vadd.f32 %v619_v50, %v517_v39  ;;  %v2367_v60 = vpack.c.bf16 %v661_v55, %v657_v46  ;;  %v663_v61 = vadd.f32 %v662_v58, %v525_v42 }
  0xeb   : > { %v783_v57 = vpop.f32.mrf.mxu0  ;;  %v944_v42 = vrot.slane %v927_v4, %v3014_v35 }
  0xec   : > { %2348 = vst [vmem:[#allocation2] sm:$0xff] %v2347_v52   ;;  %v2357_v59 = vpack.c.bf16 %v620_v54, %v616_v49  ;;  %2368 = vst [vmem:[#allocation2 + $0x10] sm:$0xff] %v2367_v60   ;;  %v2377_v2 = vpack.c.bf16 %v663_v61, %v659_v53  ;;  %v784_v7 = vadd.f32 %v783_v57, %v684_v56 }
  0xed   : > { %v785_v0 = vpop.f32.mrf.mxu0  ;;  %v826_v1 = vpop.f32.mrf.mxu1 }
  0xee   : > { %2358 = vst [vmem:[#allocation2 + $0x8] sm:$0xff] %v2357_v59   ;;  %2378 = vst [vmem:[#allocation2 + $0x18] sm:$0xff] %v2377_v2   ;;  %v827_v8 = vadd.f32 %v826_v1, %v692_v62  ;;  %v786_v10 = vadd.f32 %v785_v0, %v688_v63 }
  0xef   : > { %v787_v5 = vpop.f32.mrf.mxu0  ;;  %v828_v6 = vpop.f32.mrf.mxu1 }
  0xf0   : > { %v788_v9 = vadd.f32 %v787_v5, %v684_v56  ;;  %v829_v15 = vadd.f32 %v828_v6, %v696_v3 }
  0xf1   : > { %v789_v11 = vpop.f32.mrf.mxu0  ;;  %v830_v12 = vpop.f32.mrf.mxu1 }
  0xf2   : > { %v2352_v14 = vpack.c.bf16 %v788_v9, %v784_v7  ;;  %v790_v16 = vadd.f32 %v789_v11, %v688_v63  ;;  %v831_v17 = vadd.f32 %v830_v12, %v692_v62 }
  0xf3   : > { %v1031_v18 = vpop.f32.mrf.mxu0  ;;  %v832_v19 = vpop.f32.mrf.mxu1  ;;  %v2596_v20 = vld [vmem:[#allocation2] sm:$0xff]   ;;  %v2598_v49 = vld [vmem:[#allocation2 + $0x10] sm:$0xff]  }
  0xf4   : > { %2353 = vst [vmem:[#allocation3] sm:$0xff] %v2352_v14   ;;  %v2362_v21 = vpack.c.bf16 %v790_v16, %v786_v10  ;;  %v2372_v22 = vpack.c.bf16 %v831_v17, %v827_v8  ;;  %v833_v23 = vadd.f32 %v832_v19, %v696_v3  ;;  %2445 = vmatpush3.bf16.xpose.msra.mxu0 %v2596_v20 }
  0xf5   : > { %v1033_v25 = vpop.f32.mrf.mxu0  ;;  %v1074_v26 = vpop.f32.mrf.mxu1  ;;  %v2597_v27 = vld [vmem:[#allocation2 + $0x8] sm:$0xff]   ;;  %v1032_v29 = vadd.f32 %v1031_v18, %v932_v13  ;;  %2456 = vmatprep.subr.bf16.mxu0 %v2783_v28  ;;  %v2599_v53 = vld [vmem:[#allocation2 + $0x18] sm:$0xff]  }
  0xf6   : > { %2363 = vst [vmem:[#allocation3 + $0x8] sm:$0xff] %v2362_v21   ;;  %2373 = vst [vmem:[#allocation3 + $0x10] sm:$0xff] %v2372_v22   ;;  %v2382_v30 = vpack.c.bf16 %v833_v23, %v829_v15  ;;  %2451 = vmatpush3.bf16.xpose.msra.mxu1 %v2597_v27  ;;  %v1034_v37 = vadd.f32 %v1033_v25, %v936_v24  ;;  %v1075_v44 = vadd.f32 %v1074_v26, %v940_v31 }
  0xf7   : > { %v1035_v33 = vpop.f32.mrf.mxu0  ;;  %v1076_v36 = vpop.f32.mrf.mxu1  ;;  %2462 = vmatprep.subr.bf16.mxu1 %v2783_v28  ;;  %v1083_v40 = vmul.f32 0.35355338, %v1032_v29 }
  0xf8   : > { %2383 = vst [vmem:[#allocation3 + $0x18] sm:$0xff] %v2382_v30   ;;  %v1036_v38 = vadd.f32 %v1035_v33, %v932_v13  ;;  %v1084_v46 = vmul.f32 0.35355338, %v1034_v37  ;;  %v1077_v50 = vadd.f32 %v1076_v36, %v944_v42  ;;  %v1085_v54 = vmul.f32 0.35355338, %v1075_v44 }
  0xf9   : > { %v1037_v34 = vpop.f32.mrf.mxu0  ;;  %v1078_v39 = vpop.f32.mrf.mxu1 }
  0xfa   : > { %v1087_v41 = vmul.f32 0.35355338, %v1036_v38  ;;  %v1038_v43 = vadd.f32 %v1037_v34, %v936_v24  ;;  %v1079_v48 = vadd.f32 %v1078_v39, %v940_v31  ;;  %v1086_v35 = vmul.f32 0.35355338, %v1077_v50 }
  0xfb   : > { %v1080_v45 = vpop.f32.mrf.mxu1  ;;  %v2600_v58 = vld [vmem:[#allocation3] sm:$0xff]  }
  0xfc   : > { %v1091_v47 = vpack.c.bf16 %v1087_v41, %v1083_v40  ;;  %v1088_v32 = vmul.f32 0.35355338, %v1038_v43  ;;  %v1081_v52 = vadd.f32 %v1080_v45, %v944_v42  ;;  %v1089_v55 = vmul.f32 0.35355338, %v1079_v48 }
  0xfd   : > { %v2601_v60 = vld [vmem:[#allocation3 + $0x8] sm:$0xff]  }
  0xfe   : > { %v1092_v51 = vpack.c.bf16 %v1088_v32, %v1084_v46  ;;  %2447 = vmatmul.mubr.bf16.vlgmr.msra.gmra.mxu0 %v1091_v47  ;;  %v1090_v56 = vmul.f32 0.35355338, %v1081_v52  ;;  %v1093_v57 = vpack.c.bf16 %v1089_v55, %v1085_v54 }
  0xff   : > { %2457 = vmatpush3.bf16.xpose.msra.mxu0 %v2598_v49  ;;  %2458 = vmatprep.mubr.msk.bf16.mxu0 %vm2784_vm1, %v2783_v28 }
 0x100   : > { %2453 = vmatmul.mubr.bf16.vlgmr.msra.gmra.mxu1 %v1092_v51  ;;  %2468 = vmatprep.subr.bf16.mxu0 %v2783_v28  ;;  %v1094_v59 = vpack.c.bf16 %v1090_v56, %v1086_v35 }
 0x101   : > { %2463 = vmatpush3.bf16.xpose.msra.mxu1 %v2599_v53  ;;  %2464 = vmatprep.mubr.msk.bf16.mxu1 %vm2784_vm1, %v2783_v28 }
 0x102   : > { %2474 = vmatprep.subr.bf16.mxu1 %v2783_v28 }
 0x106   : > { %2459 = vmatmul.mubr.bf16.vlgmr.msra.gmra.mxu0 %v1093_v57 }
 0x107   : > { %2469 = vmatpush3.bf16.msra.mxu0 %v2600_v58  ;;  %2470 = vmatprep.mubr.msk.bf16.mxu0 %vm2784_vm1, %v2783_v28 }
 0x108   : > { %2465 = vmatmul.mubr.bf16.vlgmr.msra.gmra.mxu1 %v1094_v59  ;;  %2480 = vmatprep.subr.bf16.mxu0 %v2783_v28 }
 0x109   : > { %2475 = vmatpush3.bf16.msra.mxu1 %v2601_v60  ;;  %2476 = vmatprep.mubr.msk.bf16.mxu1 %vm2784_vm1, %v2783_v28 }
 0x10a   : > { %2486 = vmatprep.subr.bf16.mxu1 %v2783_v28 }
 0x1be   : > { %v1143_v61 = vpop.f32.mrf.mxu0 }
 0x1bf   : > { %v1292_v62 = vsel %vm1291_vm2, %v1143_v61, -inf }
 0x1c0   : > { %v1190_v63 = vpop.f32.mrf.mxu1  ;;  %1293 = vmax.xlane.f32.xlu0 %v1292_v62  ;;  %v2448_v0 = vpop.f32.mrf.mxu0 }
 0x1c1   : > { %v1298_v1 = vsel %vm1291_vm2, %v1190_v63, -inf }
 0x1c2   : > { %1299 = vmax.xlane.f32.xlu1 %v1298_v1  ;;  %v1146_v2 = vpop.f32.mrf.mxu0  ;;  %v2454_v3 = vpop.f32.mrf.mxu1 }
 0x1c3   : > { %v1295_v4 = vsel %vm1291_vm2, %v1146_v2, -inf }
 0x1c4   : > { %v1193_v5 = vpop.f32.mrf.mxu1  ;;  %1296 = vmax.xlane.f32.xlu0 %v1295_v4  ;;  %v2449_v6 = vpop.f32.mrf.mxu0 }
 0x1c5   : > { %v1301_v7 = vsel %vm1291_vm2, %v1193_v5, -inf }
 0x1c6   : > { %1302 = vmax.xlane.f32.xlu1 %v1301_v7  ;;  %v2455_v8 = vpop.f32.mrf.mxu1  ;;  %v1237_v9 = vpop.f32.mrf.mxu0 }
 0x1c7   : > { %v1304_v10 = vsel %vm1291_vm2, %v1237_v9, -inf }
 0x1c8   : > { %v1284_v11 = vpop.f32.mrf.mxu1  ;;  %1305 = vmax.xlane.f32.xlu0 %v1304_v10  ;;  %v2460_v12 = vpop.f32.mrf.mxu0 }
 0x1c9   : > { %v1310_v15 = vsel %vm1291_vm2, %v1284_v11, -inf }
 0x1ca   : > { %v1240_v13 = vpop.f32.mrf.mxu0  ;;  %v2466_v14 = vpop.f32.mrf.mxu1 }
 0x1cb   : > { %v1307_v16 = vsel %vm1291_vm2, %v1240_v13, -inf  ;;  %v2604_v14 = vld [vmem:[%s3285_s6 + $0x78] sm:$0xff]  }
 0x1cc   : > { %v1287_v17 = vpop.f32.mrf.mxu1  ;;  %1311 = vmax.xlane.f32.xlu0 %v1310_v15  ;;  %1308 = vmax.xlane.f32.xlu1 %v1307_v16  ;;  %v2461_v18 = vpop.f32.mrf.mxu0  ;;  %v2602_v16 = vld [vmem:[#allocation3 + $0x10] sm:$0xff]  }
 0x1cd   : > { %v1313_v20 = vsel %vm1291_vm2, %v1287_v17, -inf }
 0x1ce   : > { %v2467_v19 = vpop.f32.mrf.mxu1 }
 0x1d0   : > { %1314 = vmax.xlane.f32.xlu1 %v1313_v20 }
 0x249   : > { %v1294_v21 = vpop.xlane.xlu0 %1293 }
 0x24a   : > { %v1316_v22 = vsub.f32 %v1143_v61, %v1294_v21  ;;  %v2609_v21 = vld [vmem:[%s3285_s6 + $0xf8] sm:$0xff]  }
 0x24b   : > { %v1300_v23 = vpop.xlane.xlu1 %1299 }
 0x24c   : > { %v1324_v24 = vmul.f32 1.442695, %v1316_v22  ;;  %v1318_v25 = vsub.f32 %v1190_v63, %v1300_v23 }
 0x24d   : > { %v1297_v26 = vpop.xlane.xlu0 %1296 }
 0x24e   : > { %2642 = vpow2.f32 %v1324_v24  ;;  %v1328_v27 = vmul.f32 1.442695, %v1318_v25  ;;  %v1317_v29 = vsub.f32 %v1146_v2, %v1297_v26  ;;  %v2603_v24 = vld [vmem:[#allocation3 + $0x18] sm:$0xff]  }
 0x24f   : > { %v1303_v30 = vpop.xlane.xlu1 %1302  ;;  %v2605_v26 = vld [vmem:[%s3285_s6 + $0x38] sm:$0xff]  }
 0x250   : > { %2644 = vpow2.f32 %v1328_v27  ;;  %v1326_v31 = vmul.f32 1.442695, %v1317_v29  ;;  %v1319_v33 = vsub.f32 %v1193_v5, %v1303_v30  ;;  %v2606_v29 = vld [vmem:[%s3285_s6 + $0x70] sm:$0xff]  }
 0x251   : > { %v1306_v36 = vpop.xlane.xlu0 %1305 }
 0x252   : > { %2646 = vpow2.f32 %v1326_v31  ;;  %v1330_v37 = vmul.f32 1.442695, %v1319_v33  ;;  %v1320_v38 = vsub.f32 %v1237_v9, %v1306_v36  ;;  %v2611_v33 = vld [vmem:[%s3285_s6 + $0xb8] sm:$0xff]  }
 0x254   : > { %2648 = vpow2.f32 %v1330_v37  ;;  %v1332_v34 = vmul.f32 1.442695, %v1320_v38  ;;  %v2608_v37 = vld [vmem:[%s3285_s6 + $0x68] sm:$0xff]  }
 0x255   : > { %v1312_v39 = vpop.xlane.xlu0 %1311  ;;  %v1309_v40 = vpop.xlane.xlu1 %1308  ;;  %v2610_v38 = vld [vmem:[%s3285_s6 + $0x28] sm:$0xff]  }
 0x256   : > { %2650 = vpow2.f32 %v1332_v34  ;;  %v1322_v41 = vsub.f32 %v1284_v11, %v1312_v39  ;;  %v1321_v42 = vsub.f32 %v1240_v13, %v1309_v40  ;;  %v2612_v34 = vld [vmem:[%s3285_s6 + $0x60] sm:$0xff]   ;;  %v2613_v39 = vld [vmem:[%s3285_s6 + $0xf0] sm:$0xff]  }
 0x257   : > { %v2614_v40 = vld [vmem:[%s3285_s6 + $0x20] sm:$0xff]  }
 0x258   : > { %v1336_v43 = vmul.f32 1.442695, %v1322_v41  ;;  %v1334_v44 = vmul.f32 1.442695, %v1321_v42  ;;  %v2615_v41 = vld [vmem:[%s3285_s6 + $0xb0] sm:$0xff]   ;;  %v2616_v42 = vld [vmem:[%s3285_s6 + $0x58] sm:$0xff]  }
 0x259   : > { %v1315_v45 = vpop.xlane.xlu1 %1314 }
 0x25a   : > { %2652 = vpow2.f32 %v1336_v43  ;;  %v1323_v46 = vsub.f32 %v1287_v17, %v1315_v45  ;;  %v2617_v43 = vld [vmem:[%s3285_s6 + $0xe8] sm:$0xff]  }
 0x25b   : > { %v2643_v47 = vpop.eup %2642  ;;  %2654 = vpow2.f32 %v1334_v44  ;;  %v2618_v44 = vld [vmem:[%s3285_s6 + $0x18] sm:$0xff]   ;;  %v2619_v45 = vld [vmem:[%s3285_s6 + $0xa8] sm:$0xff]  }
 0x25c   : > { %v1338_v32 = vmul.f32 1.442695, %v1323_v46  ;;  %v1340_v48 = vsel %vm1291_vm2, %v2643_v47, 0.0  ;;  %v2620_v46 = vld [vmem:[%s3285_s6 + $0x50] sm:$0xff]  }
 0x25d   : > { %v2645_v49 = vpop.eup %2644  ;;  %1341 = vadd.xlane.f32.xlu0 %v1340_v48  ;;  %v2623_v48 = vld [vmem:[%s3285_s6 + $0xa0] sm:$0xff]  }
 0x25e   : > { %2656 = vpow2.f32 %v1338_v32  ;;  %v1346_v51 = vsel %vm1291_vm2, %v2645_v49, 0.0  ;;  %v2622_v32 = vld [vmem:[%s3285_s6 + $0x10] sm:$0xff]  }
 0x25f   : > { %v2647_v50 = vpop.eup %2646 }
 0x260   : > { %v1343_v52 = vsel %vm1291_vm2, %v2647_v50, 0.0 }
 0x261   : > { %v2649_v53 = vpop.eup %2648  ;;  %1347 = vadd.xlane.f32.xlu0 %v1346_v51  ;;  %1344 = vadd.xlane.f32.xlu1 %v1343_v52  ;;  %v2626_v51 = vld [vmem:[%s3285_s6 + $0x8] sm:$0xff]   ;;  %v2627_v52 = vld [vmem:[%s3285_s6 + $0x98] sm:$0xff]  }
 0x262   : > { %v1349_v35 = vsel %vm1291_vm2, %v2649_v53, 0.0 }
 0x263   : > { %v2651_v54 = vpop.eup %2650 }
 0x264   : > { %v1352_v55 = vsel %vm1291_vm2, %v2651_v54, 0.0 }
 0x265   : > { %1353 = vadd.xlane.f32.xlu0 %v1352_v55  ;;  %1350 = vadd.xlane.f32.xlu1 %v1349_v35  ;;  %v2630_v55 = vld [vmem:[%s3285_s6] sm:$0xff]   ;;  %v2631_v35 = vld [vmem:[%s3285_s6 + $0x90] sm:$0xff]  }
 0x267   : > { %v2653_v56 = vpop.eup %2652 }
 0x268   : > { %v2655_v57 = vpop.eup %2654  ;;  %v1358_v58 = vsel %vm1291_vm2, %v2653_v56, 0.0 }
 0x269   : > { %1359 = vadd.xlane.f32.xlu0 %v1358_v58  ;;  %v1355_v59 = vsel %vm1291_vm2, %v2655_v57, 0.0  ;;  %v2637_v58 = vld [vmem:[%s3285_s6 + $0xc0] sm:$0xff]  }
 0x26a   : > { %1356 = vadd.xlane.f32.xlu1 %v1355_v59  ;;  %v2638_v59 = vld [vmem:[%s3285_s6 + $0x80] sm:$0xff]  }
 0x26b   : > { %v2657_v60 = vpop.eup %2656 }
 0x26c   : > { %v1361_v61 = vsel %vm1291_vm2, %v2657_v60, 0.0 }
 0x26e   : > { %1362 = vadd.xlane.f32.xlu1 %v1361_v61 }
 0x2e6   : > { %v1342_v62 = vpop.xlane.xlu0 %1341 }
 0x2e7   : > { %2658 = vrcp.f32 %v1342_v62 }
 0x2ea   : > { %v1348_v63 = vpop.xlane.xlu0 %1347  ;;  %v1345_v0 = vpop.xlane.xlu1 %1344 }
 0x2eb   : > { %2660 = vrcp.f32 %v1348_v63 }
 0x2ec   : > { %2662 = vrcp.f32 %v1345_v0 }
 0x2ee   : > { %v1354_v1 = vpop.xlane.xlu0 %1353  ;;  %v1351_v2 = vpop.xlane.xlu1 %1350 }
 0x2ef   : > { %2664 = vrcp.f32 %v1354_v1 }
 0x2f0   : > { %2666 = vrcp.f32 %v1351_v2 }
 0x2f2   : > { %v1360_v3 = vpop.xlane.xlu0 %1359 }
 0x2f3   : > { %2668 = vrcp.f32 %v1360_v3  ;;  %v1357_v4 = vpop.xlane.xlu1 %1356 }
 0x2f4   : > { %v2659_v5 = vpop.eup %2658  ;;  %2670 = vrcp.f32 %v1357_v4 }
 0x2f5   : > { %v1372_v6 = vmul.f32 %v2659_v5, %v2643_v47  ;;  %v2621_v47 = vld [vmem:[%s3285_s6 + $0xe0] sm:$0xff]  }
 0x2f7   : > { %v1363_v7 = vpop.xlane.xlu1 %1362  ;;  %1380 = vst.msk [vmem:[%s3062_s20] sm:$0xff] %vm1291_vm2, %v1372_v6 }
 0x2f8   : > { %v2661_v8 = vpop.eup %2660  ;;  %2672 = vrcp.f32 %v1363_v7 }
 0x2f9   : > { %v2663_v9 = vpop.eup %2662  ;;  %v1374_v10 = vmul.f32 %v2661_v8, %v2645_v49  ;;  %v2624_v49 = vld [vmem:[%s3285_s6 + $0x48] sm:$0xff]  }
 0x2fa   : > { %v1373_v11 = vmul.f32 %v2663_v9, %v2647_v50  ;;  %v2625_v50 = vld [vmem:[%s3285_s6 + $0xd8] sm:$0xff]  }
 0x2fb   : > { %1382 = vst.msk [vmem:[%s3062_s20 + $0x10] sm:$0xff] %vm1291_vm2, %v1374_v10 }
 0x2fc   : > { %v2665_v12 = vpop.eup %2664  ;;  %v1388_v13 = vpack.c.bf16 %v1373_v11, %v1372_v6  ;;  %1381 = vst.msk [vmem:[%s3062_s20 + $0x8] sm:$0xff] %vm1291_vm2, %v1373_v11 }
 0x2fd   : > { %v2667_v15 = vpop.eup %2666  ;;  %v1376_v17 = vmul.f32 %v2665_v12, %v2651_v54  ;;  %v2629_v54 = vld [vmem:[%s3285_s6 + $0xd0] sm:$0xff]  }
 0x2fe   : > { %2471 = vmatmul.mubr.msk.bf16.vlgmr.msra.gmra.mxu0 %vm1291_vm2, %v1388_v13  ;;  %v1375_v18 = vmul.f32 %v2667_v15, %v2649_v53  ;;  %v2628_v53 = vld [vmem:[%s3285_s6 + $0x40] sm:$0xff]  }
 0x2ff   : > { %2481 = vmatpush3.bf16.msra.mxu0 %v2602_v16  ;;  %2482 = vmatprep.mubr.msk.bf16.mxu0 %vm2784_vm1, %v2783_v28  ;;  %1384 = vst.msk [vmem:[%s3062_s20 + $0x20] sm:$0xff] %vm1291_vm2, %v1376_v17 }
 0x300   : > { %v2669_v19 = vpop.eup %2668  ;;  %v1389_v20 = vpack.c.bf16 %v1375_v18, %v1374_v10  ;;  %2400 = vmatprep.subr.bf16.mxu0 %v2604_v14  ;;  %1383 = vst.msk [vmem:[%s3062_s20 + $0x18] sm:$0xff] %vm1291_vm2, %v1375_v18 }
 0x301   : > { %v2671_v22 = vpop.eup %2670  ;;  %v1378_v23 = vmul.f32 %v2669_v19, %v2653_v56  ;;  %v2635_v56 = vld [vmem:[%s3285_s6 + $0xc8] sm:$0xff]  }
 0x302   : > { %2477 = vmatmul.mubr.msk.bf16.vlgmr.msra.gmra.mxu1 %vm1291_vm2, %v1389_v20  ;;  %v1377_v25 = vmul.f32 %v2671_v22, %v2655_v57  ;;  %v2636_v57 = vld [vmem:[%s3285_s6 + $0x88] sm:$0xff]  }
 0x303   : > { %2487 = vmatpush3.bf16.msra.mxu1 %v2603_v24  ;;  %2488 = vmatprep.mubr.msk.bf16.mxu1 %vm2784_vm1, %v2783_v28  ;;  %1386 = vst.msk [vmem:[%s3062_s20 + $0x30] sm:$0xff] %vm1291_vm2, %v1378_v23  ;;  %v2607_v28 = vld [vmem:[%s3285_s6 + $0x30] sm:$0xff]  }
 0x304   : > { %v1390_v27 = vpack.c.bf16 %v1377_v25, %v1376_v17  ;;  %2422 = vmatprep.subr.bf16.mxu1 %v2609_v21  ;;  %1385 = vst.msk [vmem:[%s3062_s20 + $0x28] sm:$0xff] %vm1291_vm2, %v1377_v25 }
 0x305   : > { %v2673_v30 = vpop.eup %2672 }
 0x306   : > { %v1379_v31 = vmul.f32 %v2673_v30, %v2657_v60  ;;  %2483 = vmatmul.mubr.msk.bf16.vlgmr.msra.gmra.mxu0 %vm1291_vm2, %v1390_v27 }
 0x307   : > { %2401 = vmatpush3.bf16.msra.mxu0 %v2605_v26 }
 0x308   : > { %v1391_v36 = vpack.c.bf16 %v1379_v31, %v1378_v23  ;;  %2402 = vmatprep.subr.bf16.mxu0 %v2606_v29  ;;  %1387 = vst.msk [vmem:[%s3062_s20 + $0x38] sm:$0xff] %vm1291_vm2, %v1379_v31  ;;  %s2680_s20 = scalar_lea.vmem %s2679_s17, 2048 }
 0x309   : > { %p2682_p2 = scmp.lt.s32.totalorder %s2680_s20, %s2674_s28 }
 0x30a   : > { %2489 = vmatmul.mubr.msk.bf16.vlgmr.msra.gmra.mxu1 %vm1291_vm2, %v1391_v36 }
 0x30b   : > { %2403 = vmatpush3.bf16.msra.mxu0 %v2607_v28  ;;  %2423 = vmatpush3.bf16.msra.mxu1 %v2611_v33  ;;  %p2683_p3 = por %p2682_p2, %p2681_p1 }
 0x30c   : > { %2404 = vmatprep.subr.bf16.mxu0 %v2608_v37  ;;  %2424 = vmatprep.subr.bf16.mxu1 %v2613_v39 }
 0x30d   : > { %p2684_p5 = pnand %p2683_p3, %p2677_p0 }
 0x30f   : > { %2405 = vmatpush3.bf16.msra.mxu0 %v2610_v38  ;;  %2425 = vmatpush3.bf16.msra.mxu1 %v2615_v41 }
 0x310   : > { %2406 = vmatprep.subr.bf16.mxu0 %v2612_v34  ;;  %2426 = vmatprep.subr.bf16.mxu1 %v2617_v43 }
 0x313   : > { %2407 = vmatpush3.bf16.msra.mxu0 %v2614_v40  ;;  %2427 = vmatpush3.bf16.msra.mxu1 %v2619_v45 }
 0x314   : > { %2408 = vmatprep.subr.bf16.mxu0 %v2616_v42  ;;  %2428 = vmatprep.subr.bf16.mxu1 %v2621_v47 }
 0x317   : > { %2409 = vmatpush3.bf16.msra.mxu0 %v2618_v44  ;;  %2429 = vmatpush3.bf16.msra.mxu1 %v2623_v48 }
 0x318   : > { %2410 = vmatprep.subr.bf16.mxu0 %v2620_v46  ;;  %2430 = vmatprep.subr.bf16.mxu1 %v2625_v50 }
 0x31b   : > { %2411 = vmatpush3.bf16.msra.mxu0 %v2622_v32  ;;  %2431 = vmatpush3.bf16.msra.mxu1 %v2627_v52 }
 0x31c   : > { %2412 = vmatprep.subr.bf16.mxu0 %v2624_v49  ;;  %2432 = vmatprep.subr.bf16.mxu1 %v2629_v54 }
 0x31f   : > { %2413 = vmatpush3.bf16.msra.mxu0 %v2626_v51  ;;  %2433 = vmatpush3.bf16.msra.mxu1 %v2631_v35 }
 0x320   : > { %2414 = vmatprep.subr.bf16.mxu0 %v2628_v53  ;;  %2434 = vmatprep.subr.bf16.mxu1 %v2635_v56 }
 0x323   : > { %2415 = vmatpush3.bf16.msra.mxu0 %v2630_v55  ;;  %2435 = vmatpush3.bf16.msra.mxu1 %v2636_v57 }
 0x324   : > { %2436 = vmatprep.subr.bf16.mxu1 %v2637_v58 }
 0x327   : > { %2437 = vmatpush3.bf16.msra.mxu1 %v2638_v59 }
 0x3be   : > { %v1437_v60 = vpop.f32.mrf.mxu0 }
 0x3bf   : > { %v2334_v61 = vpack.c.bf16 %v1437_v60, %v1437_v60 }
 0x3c0   : > { %v2472_v62 = vpop.f32.mrf.mxu0 }
 0x3c1   : > { %1452 = vst [vmem:[#allocation4] sm:$0xf] %v2334_v61 }
 0x3c2   : > { %v1440_v63 = vpop.f32.mrf.mxu0  ;;  %v1499_v0 = vpop.f32.mrf.mxu1 }
 0x3c3   : > { %v2335_v1 = vpack.c.bf16 %v1440_v63, %v1440_v63  ;;  %v2336_v2 = vpack.c.bf16 %v1499_v0, %v1499_v0 }
 0x3c4   : > { %v2473_v3 = vpop.f32.mrf.mxu0  ;;  %v2478_v4 = vpop.f32.mrf.mxu1 }
 0x3c5   : > { %1453 = vst [vmem:[#allocation4 + $0x10] sm:$0xf] %v2335_v1  ;;  %1514 = vst [vmem:[#allocation4 + $0x4] sm:$0xf] %v2336_v2 }
 0x3c6   : > { %v1502_v5 = vpop.f32.mrf.mxu1  ;;  %v1561_v6 = vpop.f32.mrf.mxu0 }
 0x3c7   : > { %v2337_v7 = vpack.c.bf16 %v1502_v5, %v1502_v5  ;;  %v2338_v8 = vpack.c.bf16 %v1561_v6, %v1561_v6 }
 0x3c8   : > { %v2479_v9 = vpop.f32.mrf.mxu1  ;;  %v2484_v10 = vpop.f32.mrf.mxu0 }
 0x3c9   : > { %1515 = vst [vmem:[#allocation4 + $0x14] sm:$0xf] %v2337_v7  ;;  %1576 = vst [vmem:[#allocation4 + $0x8] sm:$0xf] %v2338_v8 }
 0x3ca   : > { %v1564_v11 = vpop.f32.mrf.mxu0  ;;  %v1623_v12 = vpop.f32.mrf.mxu1 }
 0x3cb   : > { %v2339_v13 = vpack.c.bf16 %v1564_v11, %v1564_v11  ;;  %v2340_v14 = vpack.c.bf16 %v1623_v12, %v1623_v12 }
 0x3cc   : > { %v2485_v15 = vpop.f32.mrf.mxu0  ;;  %v2490_v16 = vpop.f32.mrf.mxu1  ;;  %v2632_v20 = vld [vmem:[#allocation4] ss:$16 sps:$4 sm:$0xff]  }
 0x3cd   : > { %1577 = vst [vmem:[#allocation4 + $0x18] sm:$0xf] %v2339_v13  ;;  %1638 = vst [vmem:[#allocation4 + $0xc] sm:$0xf] %v2340_v14 }
 0x3ce   : > { %v1626_v17 = vpop.f32.mrf.mxu1 }
 0x3cf   : > { %v2341_v18 = vpack.c.bf16 %v1626_v17, %v1626_v17 }
 0x3d0   : > { %v2491_v19 = vpop.f32.mrf.mxu1  ;;  %v2634_v21 = vld [vmem:[#allocation4 + $0x4] ss:$16 sps:$4 sm:$0xff]  }
 0x3d1   : > { %1639 = vst [vmem:[#allocation4 + $0x1c] sm:$0xf] %v2341_v18  ;;  %1959 = vmatprep.mubr.bf16.mxu0 %v2634_v21 }
 0x3d2   : > { %1960 = vmatmul.mubr.bf16.vlgmr.msra.gmra.mxu0 %v2632_v20 }
 0x3d4   : > { %v2639_v22 = vld [vmem:[#allocation4 + $0x8] ss:$16 sps:$4 sm:$0xff]  }
 0x3d8   : > { %v2641_v23 = vld [vmem:[#allocation4 + $0xc] ss:$16 sps:$4 sm:$0xff]  }
 0x3d9   : > { %2000 = vmatprep.mubr.bf16.mxu1 %v2641_v23 }
 0x3da   : > { %2001 = vmatmul.mubr.bf16.vlgmr.msra.gmra.mxu1 %v2639_v22 }
 0x3db   : > { %2687 = shalt.err (!%p2684_p5)
}
 0x3dc   : > { %s2688_s1 = scalar_lea.hbm %s3191_s25, 1024  ;;  %s2692_s18 = scalar_lea.hbm %s3291_s12, 2048 }
 0x3dd   : > { %p2689_p6 = scmp.ne.s32.totalorder %s3191_s25, %s2688_s1  ;;  %p2693_p10 = scmp.lt.s32.totalorder %s3191_s25, %s3291_s12 }
 0x3de   : > { %p2694_p11 = scmp.lt.s32.totalorder %s2692_s18, %s2688_s1 }
 0x3df   : > { %p2690_p7 = pnand %p2689_p6, %p2894_p4 }
 0x3e0   : > { %p2695_p12 = por %p2694_p11, %p2693_p10 }
 0x3e1   : > { %p2691_p9 = pneg %p2690_p7 }
 0x3e3   : > { %p2696_p13 = pnand %p2695_p12, %p2691_p9 }
 0x3e5   : > { %2699 = shalt.err (!%p2696_p13)
}
 0x3e6   : > { %s3294_s28 = smov 128   ;;  %s2787_s17 = smov 8   ;;  %v2270_v29 = vld [vmem:[%s3289_s10] ss:$0 sm:$0xff] }
 0x3e7   : > { %s3302_s20 = scalar_lea.sflag [#allocation8], %s3059_s16  ;;  %s2193_s30 = sshll.u32 %s3059_s16, 4 }
 0x3e8   : > { %2493 = dma.vmem_to_hbm [thread:$0]  (%p2894_p4), %s3185_s27, 1024, %s3191_s25, %s3302_s20, %s3294_s28, %s3294_s28, %s2787_s17  }
 0x3e9   : > { %s467_s27 = scalar_lea.vmem [#allocation5], %s2193_s30  ;;  %s2342_s29 = sshll.u32 %s2772_s24, 8 }
 0x3ea   : > { %s2032_s25 = sshll.u32 %s467_s27, 4  ;;  %s3228_s20 = scalar_lea.hbm %s3290_s11, %s2342_s29  ;;  %s3230_s25 = int_to_ptr.vmem [resolvable:$true] %s2032_s25 }
 0x3eb   : > { %s2012_s19 = scalar_lea.sflag [#allocation6], %s3059_s16  ;;  %s2700_s1 = scalar_lea.vmem %s3230_s25, 256 }
 0x3ec   : > { %p2701_p0 = scmp.ne.s32.totalorder %s3230_s25, %s2700_s1  ;;  %s2788_s24 = smov [#allocation5]  }
 0x3ed   : > { %s2704_s30 = sshll.u32 %s2788_s24, 4  ;;  %s2705_s30 = int_to_ptr.vmem [resolvable:$false] %s2704_s30 }
 0x3ee   : > { %p2702_p1 = pnand %p2701_p0, %p2894_p4  ;;  %s2706_s28 = scalar_lea.vmem %s2705_s30, 512 }
 0x3ef   : > { %p2707_p3 = scmp.lt.s32.totalorder %s3230_s25, %s2705_s30  ;;  %p2708_p5 = scmp.lt.s32.totalorder %s2706_s28, %s2700_s1 }
 0x3f0   : > { %p2703_p2 = pneg %p2702_p1 }
 0x3f1   : > { %p2709_p6 = por %p2708_p5, %p2707_p3 }
 0x3f3   : > { %p2710_p7 = pnand %p2709_p6, %p2703_p2 }
 0x492   : > { %v2416_v24 = vpop.f32.mrf.mxu0 }
 0x494   : > { %v2417_v25 = vpop.f32.mrf.mxu0 }
 0x495   : > { %v2418_v27 = vadd.f32 %v2417_v25, %v2416_v24 }
 0x496   : > { %v2419_v26 = vpop.f32.mrf.mxu0 }
 0x497   : > { %v1962_v33 = vadd.f32 %v2418_v27, %v2270_v29 }
 0x498   : > { %v2420_v30 = vpop.f32.mrf.mxu0 }
 0x499   : > { %v2421_v36 = vadd.f32 %v2420_v30, %v2419_v26 }
 0x49a   : > { %v2438_v31 = vpop.f32.mrf.mxu1 }
 0x49b   : > { %v1965_v40 = vadd.f32 %v2421_v36, %v2270_v29 }
 0x49c   : > { %v2439_v28 = vpop.f32.mrf.mxu1 }
 0x49d   : > { %v2440_v37 = vadd.f32 %v2439_v28, %v2438_v31 }
 0x49e   : > { %v2441_v38 = vpop.f32.mrf.mxu1 }
 0x49f   : > { %v2003_v34 = vadd.f32 %v2440_v37, %v1962_v33 }
 0x4a0   : > { %v2442_v39 = vpop.f32.mrf.mxu1 }
 0x4a1   : > { %2009 = vst.msk [vmem:[%s467_s27] sm:$0xff] %vm575_vm0, %v2003_v34  ;;  %v2443_v41 = vadd.f32 %v2442_v39, %v2441_v38 }
 0x4a3   : > { %v2006_v42 = vadd.f32 %v2443_v41, %v1965_v40 }
 0x4a5   : > { %2010 = vst.msk [vmem:[%s467_s27 + $0x8] sm:$0xff] %vm575_vm0, %v2006_v42 }
 0x4a6   : > { %2713 = shalt.err (!%p2710_p7)
}
 0x4a7   : > { %s2714_s27 = scalar_lea.hbm %s3228_s20, 256  ;;  %s2718_s18 = scalar_lea.hbm %s3290_s11, 512 }
 0x4a8   : > { %p2715_p9 = scmp.ne.s32.totalorder %s3228_s20, %s2714_s27  ;;  %p2719_p12 = scmp.lt.s32.totalorder %s3228_s20, %s3290_s11 }
 0x4a9   : > { %p2720_p13 = scmp.lt.s32.totalorder %s2718_s18, %s2714_s27 }
 0x4aa   : > { %p2716_p10 = pnand %p2715_p9, %p2894_p4 }
 0x4ab   : > { %p2721_p0 = por %p2720_p13, %p2719_p12 }
 0x4ac   : > { %p2717_p11 = pneg %p2716_p10 }
 0x4ae   : > { %p2722_p1 = pnand %p2721_p0, %p2717_p11 }
 0x4b0   : > { %2725 = shalt.err (!%p2722_p1)
}
 0x4b1   : > { %s3303_s28 = smov 128  }
 0x4b2   : > { %2492 = dma.vmem_to_hbm [thread:$0]  (%p2894_p4), %s3230_s25, 256, %s3228_s20, %s2012_s19, %s3303_s28, %s3303_s28, %s2787_s17  }
 0x4b3 PF: > { %p2503_p2 = scmp.ge.s32.totalorder %s2780_s26, 2  ;;  %s2065_s1 = sand.u32 1, %s2760_s21  }
 0x4b4   : > { %s2066_s30 = scalar_lea.sflag [#allocation6], %s2065_s1 }
 0x4b5   : > { %p2497_p3 = pnand %p2503_p2, %p2901_p8 }
 0x4b7   : > { %p2498_p5 = pneg %p2497_p3 }
 0x4b9   : > { %2751 = dma.done.wait (%p2498_p5), %s2066_s30, 256  }
 0x4ba   : > { %2753 = vsyncadd (%p2498_p5), %s2066_s30, 4294967040  ;;  %s2075_s27 = scalar_lea.sflag [#allocation8], %s2065_s1 }
 0x4bb   : > { %2755 = dma.done.wait (%p2498_p5), %s2075_s27, 1024  }
 0x4bc   : > { %2757 = vsyncadd (%p2498_p5), %s2075_s27, 4294966272  ;;  %s29_s26 = sadd.s32 1, %s2780_s26   ;;  %s3304_s13 = sld [smem:[#allocation13_spill]] }
 0x4bd   : > { %p26_p6 = scmp.ge.s32.totalorder %s29_s26, 4   ;;  %s3305_s24 = sld [smem:[#allocation11_spill]] }
 0x4be   : > { %s3306_s25 = sld [smem:[#allocation12_spill]]  ;;  %s3307_s21 = smov %s2764_s22 }
 0x4bf   : > { %s3308_s22 = smov %s2768_s23  ;;  %28 = sbr.rel (!%p26_p6) target bundleno = 8 (0x8), region = 128 }
 0x4c2   : > { %s3309_s23 = smov %s3304_s13 }
 0x4c4   :  { %2080 = vsyncpa [#allocation6], 1 }
 0x4c5   :  { %2082 = vsyncpa [#allocation6 + $0x1], 1 }
 0x4c6   :  { %2083 = vsyncpa [#allocation8], 1 }
 0x4c7   :  { %2085 = vsyncpa [#allocation8 + $0x1], 1 }

// kernel: tpu_custom_call.1
= control target key start
LH: loop header
LB: loop body
LE: loop exit
PB: predicated region body
PF: predicated region fallthrough
CT: control target
= control target key end

     0   :  { %s3279_s0 = inlined_call_operand.vmem [shape: bf16[2,16,32], index: 0, kind: input, shape index: {}]   ;;  %s3280_s1 = inlined_call_operand.vmem [shape: bf16[2,16,32], index: 1, kind: input, shape index: {}]   ;;  %s3281_s2 = inlined_call_operand.vmem [shape: bf16[2,16,32], index: 2, kind: input, shape index: {}]   ;;  %s3282_s3 = inlined_call_operand.vmem [shape: bf16[32,512], index: 3, kind: input, shape index: {}]   ;;  %s3283_s4 = inlined_call_operand.vmem [shape: bf16[32,512], index: 4, kind: input, shape index: {}]   ;;  %s3284_s5 = inlined_call_operand.vmem [shape: bf16[32,512], index: 5, kind: input, shape index: {}]   ;;  %s3285_s6 = inlined_call_operand.vmem [shape: bf16[512,32], index: 6, kind: input, shape index: {}]   ;;  %s3286_s7 = inlined_call_operand.vmem [shape: f32[1,512], index: 7, kind: input, shape index: {}]   ;;  %s3287_s8 = inlined_call_operand.vmem [shape: f32[1,512], index: 8, kind: input, shape index: {}]   ;;  %s3288_s9 = inlined_call_operand.vmem [shape: f32[1,512], index: 9, kind: input, shape index: {}]   ;;  %s3289_s10 = inlined_call_operand.vmem [shape: f32[1,32], index: 10, kind: input, shape index: {}]   ;;  %s3290_s11 = inlined_call_operand.hbm [shape: f32[2,16,32], index: 11, kind: output, shape index: {0}]   ;;  %s3291_s12 = inlined_call_operand.hbm [shape: f32[2,4,16,16], index: 12, kind: output, shape index: {1}]  }
   0x1   :  { %3295 = sst [smem:[#allocation14_spill]] %s3280_s1 }
   0x2   :  { %18 = vsyncpa [#allocation6], 0 }
   0x3   :  { %20 = vsyncpa [#allocation6 + $0x1], 0 }
   0x4   :  { %21 = vsyncpa [#allocation8], 0 }
   0x5   :  { %23 = vsyncpa [#allocation8 + $0x1], 0  ;;  %s2854_s21 = smov 0   ;;  %s2856_s22 = smov 0  }
   0x6   :  { %s2858_s23 = smov 0   ;;  %s2860_s24 = smov 0  }
   0x7   :  { %s2862_s25 = smov 0   ;;  %s2864_s26 = smov 0  }
   0x8 LB: > { %3296 = sst [smem:[#allocation11_spill]] %s2776_s25  ;;  %s2188_s27 = sadd.s32 4294967295, %s2780_s26   ;;  %s2780_s26 = sphi %s2864_s26, %s29_s26   ;;  %s2776_s25 = sphi %s2862_s25, %s3306_s25   ;;  %s2772_s24 = sphi %s2860_s24, %s3305_s24   ;;  %s2768_s23 = sphi %s2858_s23, %s3309_s23   ;;  %s2764_s22 = sphi %s2856_s22, %s3308_s22   ;;  %s2760_s21 = sphi %s2854_s21, %s3307_s21  }
   0x9   : > { %s2189_s28 = sadd.s32 4294967294, %s2780_s26   ;;  %s41_s29 = sadd.s32 1, %s2776_s25 }
   0xa   : > { %s298_s30 = sadd.s32 1, %s2768_s23  ;;  %p43_p0 = scmp.ge.s32.totalorder %s41_s29, 2 }
   0xb   : > { %p308_p1 = scmp.ne.s32.totalorder %s2768_s23, %s2764_s22  ;;  %p309_p2 = scmp.eq.s32.totalorder %s2188_s27, 1 }
   0xc   : > { %p314_p3 = scmp.ne.s32.totalorder %s2764_s22, %s2760_s21  ;;  %s3311_s29 = smov (%p43_p0, %s41_s29), 0 }
   0xd   : > { %3297 = sst [smem:[#allocation12_spill]] %s3311_s29  ;;  %p2894_p4 = por %p309_p2, %p308_p1 }
   0xe   : > { %p315_p5 = scmp.eq.s32.totalorder %s2189_s28, 1  ;;  %s293_s14 = ssub.s32 %s2776_s25, %s3311_s29 }
   0xf   : > { %p2192_p6 = scmp.ge.s32.totalorder %s2780_s26, 1  ;;  %p296_p7 = scmp.eq.s32.totalorder %s293_s14, 0 }
  0x10   : > { %p2901_p8 = por %p315_p5, %p314_p3  ;;  %p414_p9 = scmp.lt.s32.totalorder %s2780_s26, 3 }
  0x11   : > { %s2907_s16 = scalar_select %p296_p7, %s2768_s23, %s298_s30  }
  0x12   : > { %p415_p10 = pnand %p2192_p6, %p414_p9 }
  0x13   : > { %3300 = sst [smem:[#allocation13_spill]] %s2907_s16  ;;  %p476_p11 = scmp.lt.s32.totalorder (!%p415_p10), %s2772_s24, 1 }
  0x14   : > { %418 = sbr.rel (%p415_p10) target bundleno = 1203 (0x4b3), region = 64  ;;  %s3301_s1 = sld [smem:[#allocation14_spill]] (!%p415_p10) }
  0x15   : > { %s3059_s16 = sand.u32 (!%p415_p10), 1, %s2764_s22   ;;  %s2785_s14 = smov (!%p415_p10), [#allocation7]  }
  0x16   : > { %s2194_s19 = sshll.u32 (!%p415_p10), %s3059_s16, 6  ;;  %s2678_s17 = sshll.u32 (!%p415_p10), %s2785_s14, 4  ;;  %s2679_s17 = int_to_ptr.vmem [resolvable:$false] %s2678_s17 }
  0x17   : > { %s3062_s20 = scalar_lea.vmem (!%p415_p10), [#allocation7], %s2194_s19 }
  0x19   : > { %v2557_v0 = vld [vmem:[%s3283_s4 + $0x24] ss:$16 sps:$4 sm:$0xff]   ;;  %v2559_v1 = vld [vmem:[%s3283_s4 + $0x20] ss:$16 sps:$4 sm:$0xff]   ;;  %v2782_v2 = vmov 0   ;;  %s477_s30 = scalar_select %p476_p11, %s2772_s24, 1  ;;  %v510_v29 = vlaneseq }
  0x1a   : > { %611 = vmatprep.mubr.bf16.mxu0 %v2782_v2  ;;  %654 = vmatprep.mubr.bf16.mxu1 %v2782_v2  ;;  %v2560_v3 = vld [vmem:[%s3283_s4 + $0x2c] ss:$16 sps:$4 sm:$0xff]   ;;  %v2562_v4 = vld [vmem:[%s3283_s4 + $0x4] ss:$16 sps:$4 sm:$0xff]   ;;  %v2564_v5 = vld [vmem:[%s3283_s4 + $0x28] ss:$16 sps:$4 sm:$0xff]  }
  0x1b   : > { %591 = vmatprep.subr.bf16.mxu0 %v2557_v0  ;;  %v2565_v6 = vld [vmem:[%s3283_s4] ss:$16 sps:$4 sm:$0xff]   ;;  %634 = vmatprep.subr.bf16.mxu1 %v2560_v3  ;;  %v2566_v7 = vld [vmem:[%s3283_s4 + $0xc] ss:$16 sps:$4 sm:$0xff]   ;;  %s2932_s27 = sshll.u32 %s477_s30, 3  ;;  %vm575_vm0 = vcmask 261120  }
  0x1c   : > { %592 = vmatpush1.bf16.msra.mxu0 %v2559_v1  ;;  %635 = vmatpush1.bf16.msra.mxu1 %v2564_v5  ;;  %s489_s29 = scalar_lea.vmem %s3301_s1, %s2932_s27  ;;  %v2569_v8 = vld [vmem:[%s3283_s4 + $0x8] ss:$16 sps:$4 sm:$0xff]   ;;  %v2570_v10 = vld [vmem:[%s3284_s5 + $0x20] ss:$16 sps:$4 sm:$0xff]   ;;  %v2572_v11 = vld [vmem:[%s3284_s5 + $0x24] ss:$16 sps:$4 sm:$0xff]   ;;  %s494_s30 = scalar_lea.vmem %s3281_s2, %s2932_s27 }
  0x1d   : > { %593 = vmatprep.subr.bf16.mxu0 %v2562_v4  ;;  %636 = vmatprep.subr.bf16.mxu1 %v2566_v7  ;;  %v2568_v9 = vld [vmem:[%s489_s29] sm:$0xff]   ;;  %v2575_v12 = vld [vmem:[%s3284_s5 + $0x2c] ss:$16 sps:$4 sm:$0xff]   ;;  %v2573_v13 = vld [vmem:[%s3284_s5 + $0x28] ss:$16 sps:$4 sm:$0xff]   ;;  %s483_s1 = scalar_lea.vmem %s3279_s0, %s2932_s27  ;;  %v2783_v28 = vmov 0.0  }
  0x1e   : > { %v2578_v14 = vld [vmem:[%s3284_s5 + $0x4] ss:$16 sps:$4 sm:$0xff]   ;;  %v2576_v15 = vld [vmem:[%s3284_s5] ss:$16 sps:$4 sm:$0xff]   ;;  %v2581_v16 = vld [vmem:[%s3284_s5 + $0xc] ss:$16 sps:$4 sm:$0xff]  }
  0x1f   : > { %v2579_v17 = vld [vmem:[%s3284_s5 + $0x8] ss:$16 sps:$4 sm:$0xff]   ;;  %v2582_v18 = vld [vmem:[%s494_s30] sm:$0xff]   ;;  %v2588_v21 = vld [vmem:[%s3282_s3 + $0x2c] ss:$16 sps:$4 sm:$0xff]   ;;  %vm2784_vm1 = vmmov 0  }
  0x20   : > { %594 = vmatpush1.bf16.msra.mxu0 %v2565_v6  ;;  %637 = vmatpush1.bf16.msra.mxu1 %v2569_v8  ;;  %v2585_v19 = vld [vmem:[%s3282_s3 + $0x24] ss:$16 sps:$4 sm:$0xff]   ;;  %v2583_v20 = vld [vmem:[%s3282_s3 + $0x20] ss:$16 sps:$4 sm:$0xff]   ;;  %v2586_v23 = vld [vmem:[%s3282_s3 + $0x28] ss:$16 sps:$4 sm:$0xff]  }
  0x21   : > { %761 = vmatprep.subr.bf16.mxu0 %v2572_v11  ;;  %804 = vmatprep.subr.bf16.mxu1 %v2575_v12  ;;  %v2591_v22 = vld [vmem:[%s3282_s3 + $0x4] ss:$16 sps:$4 sm:$0xff]   ;;  %v2589_v24 = vld [vmem:[%s3282_s3] ss:$16 sps:$4 sm:$0xff]   ;;  %v2594_v25 = vld [vmem:[%s3282_s3 + $0xc] ss:$16 sps:$4 sm:$0xff]  }
  0x22   : > { %v2592_v26 = vld [vmem:[%s3282_s3 + $0x8] ss:$16 sps:$4 sm:$0xff]   ;;  %v2595_v27 = vld [vmem:[%s483_s1] sm:$0xff]   ;;  %v511_v30 = vshrl.u32 %v510_v29, 7  ;;  %vm1291_vm2 = vcmask 130048   ;;  %s2050_s27 = sshll.u32 %s3062_s20, 4  ;;  %s3185_s27 = int_to_ptr.vmem [resolvable:$true] %s2050_s27 }
  0x23   : > { %2210 = vmatmul.mubr.msk.bf16.vlgmr.msra.gmra.mxu0 %vm575_vm0, %v2568_v9  ;;  %2211 = vmatmul.mubr.msk.bf16.vlgmr.msra.gmra.mxu1 %vm575_vm0, %v2568_v9  ;;  %v508_v33 = vld [vmem:[%s3287_s8] sm:$0xf]  ;;  %s2343_s30 = sshll.u32 %s2772_s24, 10  ;;  %s2674_s28 = scalar_lea.vmem %s3185_s27, 1024 }
  0x24   : > { %762 = vmatpush1.bf16.msra.mxu0 %v2570_v10  ;;  %781 = vmatprep.mubr.bf16.mxu0 %v2782_v2  ;;  %v512_v31 = vsub.s32 0, %v511_v30  ;;  %v3009_v32 = vsub.s32 2, %v511_v30  ;;  %v516_v34 = vsub.s32 1, %v511_v30  ;;  %v3014_v35 = vsub.s32 3, %v511_v30  ;;  %v679_v48 = vld [vmem:[%s3288_s9] sm:$0xf]  ;;  %s3191_s25 = scalar_lea.hbm %s3291_s12, %s2343_s30  ;;  %p2675_p12 = scmp.ne.s32.totalorder %s3185_s27, %s2674_s28 }
  0x25   : > { %763 = vmatprep.subr.bf16.mxu0 %v2578_v14  ;;  %805 = vmatpush1.bf16.msra.mxu1 %v2573_v13  ;;  %v927_v4 = vld [vmem:[%s3286_s7] sm:$0xf]  ;;  %p2681_p1 = scmp.lt.s32.totalorder %s3185_s27, %s2679_s17 }
  0x26   : > { %824 = vmatprep.mubr.bf16.mxu1 %v2782_v2  ;;  %806 = vmatprep.subr.bf16.mxu1 %v2581_v16  ;;  %v513_v37 = vrot.slane %v508_v33, %v512_v31  ;;  %v521_v38 = vrot.slane %v508_v33, %v3009_v32  ;;  %v517_v39 = vrot.slane %v508_v33, %v516_v34  ;;  %p2676_p13 = pnand %p2675_p12, %p2894_p4 }
  0x27   : > { %v525_v42 = vrot.slane %v508_v33, %v3014_v35  ;;  %v684_v56 = vrot.slane %v679_v48, %v512_v31  ;;  %v692_v62 = vrot.slane %v679_v48, %v3009_v32  ;;  %v688_v63 = vrot.slane %v679_v48, %v516_v34 }
  0x28   : > { %764 = vmatpush1.bf16.msra.mxu0 %v2576_v15  ;;  %v696_v3 = vrot.slane %v679_v48, %v3014_v35  ;;  %v932_v13 = vrot.slane %v927_v4, %v512_v31  ;;  %v940_v31 = vrot.slane %v927_v4, %v3009_v32  ;;  %p2677_p0 = pneg %p2676_p13 }
  0x29   : > { %1009 = vmatprep.subr.bf16.mxu0 %v2585_v19  ;;  %807 = vmatpush1.bf16.msra.mxu1 %v2579_v17 }
  0x2a   : > { %1052 = vmatprep.subr.bf16.mxu1 %v2588_v21 }
  0x2b   : > { %2221 = vmatmul.mubr.msk.bf16.vlgmr.msra.gmra.mxu0 %vm575_vm0, %v2582_v18 }
  0x2c   : > { %1010 = vmatpush1.bf16.msra.mxu0 %v2583_v20  ;;  %1029 = vmatprep.mubr.bf16.mxu0 %v2782_v2 }
  0x2d   : > { %2222 = vmatmul.mubr.msk.bf16.vlgmr.msra.gmra.mxu1 %vm575_vm0, %v2582_v18  ;;  %1011 = vmatprep.subr.bf16.mxu0 %v2591_v22 }
  0x2e   : > { %1053 = vmatpush1.bf16.msra.mxu1 %v2586_v23  ;;  %1072 = vmatprep.mubr.bf16.mxu1 %v2782_v2 }
  0x2f   : > { %1054 = vmatprep.subr.bf16.mxu1 %v2594_v25 }
  0x30   : > { %1012 = vmatpush1.bf16.msra.mxu0 %v2589_v24  ;;  %v936_v24 = vrot.slane %v927_v4, %v516_v34 }
  0x31   : > { %2444 = vmatprep.subr.bf16.mxu0 %v2783_v28 }
  0x32   : > { %1055 = vmatpush1.bf16.msra.mxu1 %v2592_v26 }
  0x33   : > { %2248 = vmatmul.mubr.msk.bf16.vlgmr.msra.gmra.mxu0 %vm575_vm0, %v2595_v27  ;;  %2450 = vmatprep.subr.bf16.mxu1 %v2783_v28 }
  0x34   : > { %2446 = vmatprep.mubr.msk.bf16.mxu0 %vm2784_vm1, %v2783_v28 }
  0x35   : > { %2249 = vmatmul.mubr.msk.bf16.vlgmr.msra.gmra.mxu1 %vm575_vm0, %v2595_v27 }
  0x36   : > { %2452 = vmatprep.mubr.msk.bf16.mxu1 %vm2784_vm1, %v2783_v28 }
  0xe3   : > { %v613_v36 = vpop.f32.mrf.mxu0  ;;  %v656_v41 = vpop.f32.mrf.mxu1 }
  0xe4   : > { %v614_v45 = vadd.f32 %v613_v36, %v513_v37  ;;  %v657_v46 = vadd.f32 %v656_v41, %v521_v38 }
  0xe5   : > { %v615_v40 = vpop.f32.mrf.mxu0  ;;  %v658_v44 = vpop.f32.mrf.mxu1 }
  0xe6   : > { %v616_v49 = vadd.f32 %v615_v40, %v517_v39  ;;  %v659_v53 = vadd.f32 %v658_v44, %v525_v42 }
  0xe7   : > { %v617_v43 = vpop.f32.mrf.mxu0  ;;  %v660_v51 = vpop.f32.mrf.mxu1 }
  0xe8   : > { %v618_v47 = vadd.f32 %v617_v43, %v513_v37  ;;  %v661_v55 = vadd.f32 %v660_v51, %v521_v38 }
  0xe9   : > { %v619_v50 = vpop.f32.mrf.mxu0  ;;  %v662_v58 = vpop.f32.mrf.mxu1 }
  0xea   : > { %v2347_v52 = vpack.c.bf16 %v618_v47, %v614_v45  ;;  %v620_v54 = vadd.f32 %v619_v50, %v517_v39  ;;  %v2367_v60 = vpack.c.bf16 %v661_v55, %v657_v46  ;;  %v663_v61 = vadd.f32 %v662_v58, %v525_v42 }
  0xeb   : > { %v783_v57 = vpop.f32.mrf.mxu0  ;;  %v944_v42 = vrot.slane %v927_v4, %v3014_v35 }
  0xec   : > { %2348 = vst [vmem:[#allocation2] sm:$0xff] %v2347_v52   ;;  %v2357_v59 = vpack.c.bf16 %v620_v54, %v616_v49  ;;  %2368 = vst [vmem:[#allocation2 + $0x10] sm:$0xff] %v2367_v60   ;;  %v2377_v2 = vpack.c.bf16 %v663_v61, %v659_v53  ;;  %v784_v7 = vadd.f32 %v783_v57, %v684_v56 }
  0xed   : > { %v785_v0 = vpop.f32.mrf.mxu0  ;;  %v826_v1 = vpop.f32.mrf.mxu1 }
  0xee   : > { %2358 = vst [vmem:[#allocation2 + $0x8] sm:$0xff] %v2357_v59   ;;  %2378 = vst [vmem:[#allocation2 + $0x18] sm:$0xff] %v2377_v2   ;;  %v827_v8 = vadd.f32 %v826_v1, %v692_v62  ;;  %v786_v10 = vadd.f32 %v785_v0, %v688_v63 }
  0xef   : > { %v787_v5 = vpop.f32.mrf.mxu0  ;;  %v828_v6 = vpop.f32.mrf.mxu1 }
  0xf0   : > { %v788_v9 = vadd.f32 %v787_v5, %v684_v56  ;;  %v829_v15 = vadd.f32 %v828_v6, %v696_v3 }
  0xf1   : > { %v789_v11 = vpop.f32.mrf.mxu0  ;;  %v830_v12 = vpop.f32.mrf.mxu1 }
  0xf2   : > { %v2352_v14 = vpack.c.bf16 %v788_v9, %v784_v7  ;;  %v790_v16 = vadd.f32 %v789_v11, %v688_v63  ;;  %v831_v17 = vadd.f32 %v830_v12, %v692_v62 }
  0xf3   : > { %v1031_v18 = vpop.f32.mrf.mxu0  ;;  %v832_v19 = vpop.f32.mrf.mxu1  ;;  %v2596_v20 = vld [vmem:[#allocation2] sm:$0xff]   ;;  %v2598_v49 = vld [vmem:[#allocation2 + $0x10] sm:$0xff]  }
  0xf4   : > { %2353 = vst [vmem:[#allocation3] sm:$0xff] %v2352_v14   ;;  %v2362_v21 = vpack.c.bf16 %v790_v16, %v786_v10  ;;  %v2372_v22 = vpack.c.bf16 %v831_v17, %v827_v8  ;;  %v833_v23 = vadd.f32 %v832_v19, %v696_v3  ;;  %2445 = vmatpush3.bf16.xpose.msra.mxu0 %v2596_v20 }
  0xf5   : > { %v1033_v25 = vpop.f32.mrf.mxu0  ;;  %v1074_v26 = vpop.f32.mrf.mxu1  ;;  %v2597_v27 = vld [vmem:[#allocation2 + $0x8] sm:$0xff]   ;;  %v1032_v29 = vadd.f32 %v1031_v18, %v932_v13  ;;  %2456 = vmatprep.subr.bf16.mxu0 %v2783_v28  ;;  %v2599_v53 = vld [vmem:[#allocation2 + $0x18] sm:$0xff]  }
  0xf6   : > { %2363 = vst [vmem:[#allocation3 + $0x8] sm:$0xff] %v2362_v21   ;;  %2373 = vst [vmem:[#allocation3 + $0x10] sm:$0xff] %v2372_v22   ;;  %v2382_v30 = vpack.c.bf16 %v833_v23, %v829_v15  ;;  %2451 = vmatpush3.bf16.xpose.msra.mxu1 %v2597_v27  ;;  %v1034_v37 = vadd.f32 %v1033_v25, %v936_v24  ;;  %v1075_v44 = vadd.f32 %v1074_v26, %v940_v31 }
  0xf7   : > { %v1035_v33 = vpop.f32.mrf.mxu0  ;;  %v1076_v36 = vpop.f32.mrf.mxu1  ;;  %2462 = vmatprep.subr.bf16.mxu1 %v2783_v28  ;;  %v1083_v40 = vmul.f32 0.35355338, %v1032_v29 }
  0xf8   : > { %2383 = vst [vmem:[#allocation3 + $0x18] sm:$0xff] %v2382_v30   ;;  %v1036_v38 = vadd.f32 %v1035_v33, %v932_v13  ;;  %v1084_v46 = vmul.f32 0.35355338, %v1034_v37  ;;  %v1077_v50 = vadd.f32 %v1076_v36, %v944_v42  ;;  %v1085_v54 = vmul.f32 0.35355338, %v1075_v44 }
  0xf9   : > { %v1037_v34 = vpop.f32.mrf.mxu0  ;;  %v1078_v39 = vpop.f32.mrf.mxu1 }
  0xfa   : > { %v1087_v41 = vmul.f32 0.35355338, %v1036_v38  ;;  %v1038_v43 = vadd.f32 %v1037_v34, %v936_v24  ;;  %v1079_v48 = vadd.f32 %v1078_v39, %v940_v31  ;;  %v1086_v35 = vmul.f32 0.35355338, %v1077_v50 }
  0xfb   : > { %v1080_v45 = vpop.f32.mrf.mxu1  ;;  %v2600_v58 = vld [vmem:[#allocation3] sm:$0xff]  }
  0xfc   : > { %v1091_v47 = vpack.c.bf16 %v1087_v41, %v1083_v40  ;;  %v1088_v32 = vmul.f32 0.35355338, %v1038_v43  ;;  %v1081_v52 = vadd.f32 %v1080_v45, %v944_v42  ;;  %v1089_v55 = vmul.f32 0.35355338, %v1079_v48 }
  0xfd   : > { %v2601_v60 = vld [vmem:[#allocation3 + $0x8] sm:$0xff]  }
  0xfe   : > { %v1092_v51 = vpack.c.bf16 %v1088_v32, %v1084_v46  ;;  %2447 = vmatmul.mubr.bf16.vlgmr.msra.gmra.mxu0 %v1091_v47  ;;  %v1090_v56 = vmul.f32 0.35355338, %v1081_v52  ;;  %v1093_v57 = vpack.c.bf16 %v1089_v55, %v1085_v54 }
  0xff   : > { %2457 = vmatpush3.bf16.xpose.msra.mxu0 %v2598_v49  ;;  %2458 = vmatprep.mubr.msk.bf16.mxu0 %vm2784_vm1, %v2783_v28 }
 0x100   : > { %2453 = vmatmul.mubr.bf16.vlgmr.msra.gmra.mxu1 %v1092_v51  ;;  %2468 = vmatprep.subr.bf16.mxu0 %v2783_v28  ;;  %v1094_v59 = vpack.c.bf16 %v1090_v56, %v1086_v35 }
 0x101   : > { %2463 = vmatpush3.bf16.xpose.msra.mxu1 %v2599_v53  ;;  %2464 = vmatprep.mubr.msk.bf16.mxu1 %vm2784_vm1, %v2783_v28 }
 0x102   : > { %2474 = vmatprep.subr.bf16.mxu1 %v2783_v28 }
 0x106   : > { %2459 = vmatmul.mubr.bf16.vlgmr.msra.gmra.mxu0 %v1093_v57 }
 0x107   : > { %2469 = vmatpush3.bf16.msra.mxu0 %v2600_v58  ;;  %2470 = vmatprep.mubr.msk.bf16.mxu0 %vm2784_vm1, %v2783_v28 }
 0x108   : > { %2465 = vmatmul.mubr.bf16.vlgmr.msra.gmra.mxu1 %v1094_v59  ;;  %2480 = vmatprep.subr.bf16.mxu0 %v2783_v28 }
 0x109   : > { %2475 = vmatpush3.bf16.msra.mxu1 %v2601_v60  ;;  %2476 = vmatprep.mubr.msk.bf16.mxu1 %vm2784_vm1, %v2783_v28 }
 0x10a   : > { %2486 = vmatprep.subr.bf16.mxu1 %v2783_v28 }
 0x1be   : > { %v1143_v61 = vpop.f32.mrf.mxu0 }
 0x1bf   : > { %v1292_v62 = vsel %vm1291_vm2, %v1143_v61, -inf }
 0x1c0   : > { %v1190_v63 = vpop.f32.mrf.mxu1  ;;  %1293 = vmax.xlane.f32.xlu0 %v1292_v62  ;;  %v2448_v0 = vpop.f32.mrf.mxu0 }
 0x1c1   : > { %v1298_v1 = vsel %vm1291_vm2, %v1190_v63, -inf }
 0x1c2   : > { %1299 = vmax.xlane.f32.xlu1 %v1298_v1  ;;  %v1146_v2 = vpop.f32.mrf.mxu0  ;;  %v2454_v3 = vpop.f32.mrf.mxu1 }
 0x1c3   : > { %v1295_v4 = vsel %vm1291_vm2, %v1146_v2, -inf }
 0x1c4   : > { %v1193_v5 = vpop.f32.mrf.mxu1  ;;  %1296 = vmax.xlane.f32.xlu0 %v1295_v4  ;;  %v2449_v6 = vpop.f32.mrf.mxu0 }
 0x1c5   : > { %v1301_v7 = vsel %vm1291_vm2, %v1193_v5, -inf }
 0x1c6   : > { %1302 = vmax.xlane.f32.xlu1 %v1301_v7  ;;  %v2455_v8 = vpop.f32.mrf.mxu1  ;;  %v1237_v9 = vpop.f32.mrf.mxu0 }
 0x1c7   : > { %v1304_v10 = vsel %vm1291_vm2, %v1237_v9, -inf }
 0x1c8   : > { %v1284_v11 = vpop.f32.mrf.mxu1  ;;  %1305 = vmax.xlane.f32.xlu0 %v1304_v10  ;;  %v2460_v12 = vpop.f32.mrf.mxu0 }
 0x1c9   : > { %v1310_v15 = vsel %vm1291_vm2, %v1284_v11, -inf }
 0x1ca   : > { %v1240_v13 = vpop.f32.mrf.mxu0  ;;  %v2466_v14 = vpop.f32.mrf.mxu1 }
 0x1cb   : > { %v1307_v16 = vsel %vm1291_vm2, %v1240_v13, -inf  ;;  %v2604_v14 = vld [vmem:[%s3285_s6 + $0x78] sm:$0xff]  }
 0x1cc   : > { %v1287_v17 = vpop.f32.mrf.mxu1  ;;  %1311 = vmax.xlane.f32.xlu0 %v1310_v15  ;;  %1308 = vmax.xlane.f32.xlu1 %v1307_v16  ;;  %v2461_v18 = vpop.f32.mrf.mxu0  ;;  %v2602_v16 = vld [vmem:[#allocation3 + $0x10] sm:$0xff]  }
 0x1cd   : > { %v1313_v20 = vsel %vm1291_vm2, %v1287_v17, -inf }
 0x1ce   : > { %v2467_v19 = vpop.f32.mrf.mxu1 }
 0x1d0   : > { %1314 = vmax.xlane.f32.xlu1 %v1313_v20 }
 0x249   : > { %v1294_v21 = vpop.xlane.xlu0 %1293 }
 0x24a   : > { %v1316_v22 = vsub.f32 %v1143_v61, %v1294_v21  ;;  %v2609_v21 = vld [vmem:[%s3285_s6 + $0xf8] sm:$0xff]  }
 0x24b   : > { %v1300_v23 = vpop.xlane.xlu1 %1299 }
 0x24c   : > { %v1324_v24 = vmul.f32 1.442695, %v1316_v22  ;;  %v1318_v25 = vsub.f32 %v1190_v63, %v1300_v23 }
 0x24d   : > { %v1297_v26 = vpop.xlane.xlu0 %1296 }
 0x24e   : > { %2642 = vpow2.f32 %v1324_v24  ;;  %v1328_v27 = vmul.f32 1.442695, %v1318_v25  ;;  %v1317_v29 = vsub.f32 %v1146_v2, %v1297_v26  ;;  %v2603_v24 = vld [vmem:[#allocation3 + $0x18] sm:$0xff]  }
 0x24f   : > { %v1303_v30 = vpop.xlane.xlu1 %1302  ;;  %v2605_v26 = vld [vmem:[%s3285_s6 + $0x38] sm:$0xff]  }
 0x250   : > { %2644 = vpow2.f32 %v1328_v27  ;;  %v1326_v31 = vmul.f32 1.442695, %v1317_v29  ;;  %v1319_v33 = vsub.f32 %v1193_v5, %v1303_v30  ;;  %v2606_v29 = vld [vmem:[%s3285_s6 + $0x70] sm:$0xff]  }
 0x251   : > { %v1306_v36 = vpop.xlane.xlu0 %1305 }
 0x252   : > { %2646 = vpow2.f32 %v1326_v31  ;;  %v1330_v37 = vmul.f32 1.442695, %v1319_v33  ;;  %v1320_v38 = vsub.f32 %v1237_v9, %v1306_v36  ;;  %v2611_v33 = vld [vmem:[%s3285_s6 + $0xb8] sm:$0xff]  }
 0x254   : > { %2648 = vpow2.f32 %v1330_v37  ;;  %v1332_v34 = vmul.f32 1.442695, %v1320_v38  ;;  %v2608_v37 = vld [vmem:[%s3285_s6 + $0x68] sm:$0xff]  }
 0x255   : > { %v1312_v39 = vpop.xlane.xlu0 %1311  ;;  %v1309_v40 = vpop.xlane.xlu1 %1308  ;;  %v2610_v38 = vld [vmem:[%s3285_s6 + $0x28] sm:$0xff]  }
 0x256   : > { %2650 = vpow2.f32 %v1332_v34  ;;  %v1322_v41 = vsub.f32 %v1284_v11, %v1312_v39  ;;  %v1321_v42 = vsub.f32 %v1240_v13, %v1309_v40  ;;  %v2612_v34 = vld [vmem:[%s3285_s6 + $0x60] sm:$0xff]   ;;  %v2613_v39 = vld [vmem:[%s3285_s6 + $0xf0] sm:$0xff]  }
 0x257   : > { %v2614_v40 = vld [vmem:[%s3285_s6 + $0x20] sm:$0xff]  }
 0x258   : > { %v1336_v43 = vmul.f32 1.442695, %v1322_v41  ;;  %v1334_v44 = vmul.f32 1.442695, %v1321_v42  ;;  %v2615_v41 = vld [vmem:[%s3285_s6 + $0xb0] sm:$0xff]   ;;  %v2616_v42 = vld [vmem:[%s3285_s6 + $0x58] sm:$0xff]  }
 0x259   : > { %v1315_v45 = vpop.xlane.xlu1 %1314 }
 0x25a   : > { %2652 = vpow2.f32 %v1336_v43  ;;  %v1323_v46 = vsub.f32 %v1287_v17, %v1315_v45  ;;  %v2617_v43 = vld [vmem:[%s3285_s6 + $0xe8] sm:$0xff]  }
 0x25b   : > { %v2643_v47 = vpop.eup %2642  ;;  %2654 = vpow2.f32 %v1334_v44  ;;  %v2618_v44 = vld [vmem:[%s3285_s6 + $0x18] sm:$0xff]   ;;  %v2619_v45 = vld [vmem:[%s3285_s6 + $0xa8] sm:$0xff]  }
 0x25c   : > { %v1338_v32 = vmul.f32 1.442695, %v1323_v46  ;;  %v1340_v48 = vsel %vm1291_vm2, %v2643_v47, 0.0  ;;  %v2620_v46 = vld [vmem:[%s3285_s6 + $0x50] sm:$0xff]  }
 0x25d   : > { %v2645_v49 = vpop.eup %2644  ;;  %1341 = vadd.xlane.f32.xlu0 %v1340_v48  ;;  %v2623_v48 = vld [vmem:[%s3285_s6 + $0xa0] sm:$0xff]  }
 0x25e   : > { %2656 = vpow2.f32 %v1338_v32  ;;  %v1346_v51 = vsel %vm1291_vm2, %v2645_v49, 0.0  ;;  %v2622_v32 = vld [vmem:[%s3285_s6 + $0x10] sm:$0xff]  }
 0x25f   : > { %v2647_v50 = vpop.eup %2646 }
 0x260   : > { %v1343_v52 = vsel %vm1291_vm2, %v2647_v50, 0.0 }
 0x261   : > { %v2649_v53 = vpop.eup %2648  ;;  %1347 = vadd.xlane.f32.xlu0 %v1346_v51  ;;  %1344 = vadd.xlane.f32.xlu1 %v1343_v52  ;;  %v2626_v51 = vld [vmem:[%s3285_s6 + $0x8] sm:$0xff]   ;;  %v2627_v52 = vld [vmem:[%s3285_s6 + $0x98] sm:$0xff]  }
 0x262   : > { %v1349_v35 = vsel %vm1291_vm2, %v2649_v53, 0.0 }
 0x263   : > { %v2651_v54 = vpop.eup %2650 }
 0x264   : > { %v1352_v55 = vsel %vm1291_vm2, %v2651_v54, 0.0 }
 0x265   : > { %1353 = vadd.xlane.f32.xlu0 %v1352_v55  ;;  %1350 = vadd.xlane.f32.xlu1 %v1349_v35  ;;  %v2630_v55 = vld [vmem:[%s3285_s6] sm:$0xff]   ;;  %v2631_v35 = vld [vmem:[%s3285_s6 + $0x90] sm:$0xff]  }
 0x267   : > { %v2653_v56 = vpop.eup %2652 }
 0x268   : > { %v2655_v57 = vpop.eup %2654  ;;  %v1358_v58 = vsel %vm1291_vm2, %v2653_v56, 0.0 }
 0x269   : > { %1359 = vadd.xlane.f32.xlu0 %v1358_v58  ;;  %v1355_v59 = vsel %vm1291_vm2, %v2655_v57, 0.0  ;;  %v2637_v58 = vld [vmem:[%s3285_s6 + $0xc0] sm:$0xff]  }
 0x26a   : > { %1356 = vadd.xlane.f32.xlu1 %v1355_v59  ;;  %v2638_v59 = vld [vmem:[%s3285_s6 + $0x80] sm:$0xff]  }
 0x26b   : > { %v2657_v60 = vpop.eup %2656 }
 0x26c   : > { %v1361_v61 = vsel %vm1291_vm2, %v2657_v60, 0.0 }
 0x26e   : > { %1362 = vadd.xlane.f32.xlu1 %v1361_v61 }
 0x2e6   : > { %v1342_v62 = vpop.xlane.xlu0 %1341 }
 0x2e7   : > { %2658 = vrcp.f32 %v1342_v62 }
 0x2ea   : > { %v1348_v63 = vpop.xlane.xlu0 %1347  ;;  %v1345_v0 = vpop.xlane.xlu1 %1344 }
 0x2eb   : > { %2660 = vrcp.f32 %v1348_v63 }
 0x2ec   : > { %2662 = vrcp.f32 %v1345_v0 }
 0x2ee   : > { %v1354_v1 = vpop.xlane.xlu0 %1353  ;;  %v1351_v2 = vpop.xlane.xlu1 %1350 }
 0x2ef   : > { %2664 = vrcp.f32 %v1354_v1 }
 0x2f0   : > { %2666 = vrcp.f32 %v1351_v2 }
 0x2f2   : > { %v1360_v3 = vpop.xlane.xlu0 %1359 }
 0x2f3   : > { %2668 = vrcp.f32 %v1360_v3  ;;  %v1357_v4 = vpop.xlane.xlu1 %1356 }
 0x2f4   : > { %v2659_v5 = vpop.eup %2658  ;;  %2670 = vrcp.f32 %v1357_v4 }
 0x2f5   : > { %v1372_v6 = vmul.f32 %v2659_v5, %v2643_v47  ;;  %v2621_v47 = vld [vmem:[%s3285_s6 + $0xe0] sm:$0xff]  }
 0x2f7   : > { %v1363_v7 = vpop.xlane.xlu1 %1362  ;;  %1380 = vst.msk [vmem:[%s3062_s20] sm:$0xff] %vm1291_vm2, %v1372_v6 }
 0x2f8   : > { %v2661_v8 = vpop.eup %2660  ;;  %2672 = vrcp.f32 %v1363_v7 }
 0x2f9   : > { %v2663_v9 = vpop.eup %2662  ;;  %v1374_v10 = vmul.f32 %v2661_v8, %v2645_v49  ;;  %v2624_v49 = vld [vmem:[%s3285_s6 + $0x48] sm:$0xff]  }
 0x2fa   : > { %v1373_v11 = vmul.f32 %v2663_v9, %v2647_v50  ;;  %v2625_v50 = vld [vmem:[%s3285_s6 + $0xd8] sm:$0xff]  }
 0x2fb   : > { %1382 = vst.msk [vmem:[%s3062_s20 + $0x10] sm:$0xff] %vm1291_vm2, %v1374_v10 }
 0x2fc   : > { %v2665_v12 = vpop.eup %2664  ;;  %v1388_v13 = vpack.c.bf16 %v1373_v11, %v1372_v6  ;;  %1381 = vst.msk [vmem:[%s3062_s20 + $0x8] sm:$0xff] %vm1291_vm2, %v1373_v11 }
 0x2fd   : > { %v2667_v15 = vpop.eup %2666  ;;  %v1376_v17 = vmul.f32 %v2665_v12, %v2651_v54  ;;  %v2629_v54 = vld [vmem:[%s3285_s6 + $0xd0] sm:$0xff]  }
 0x2fe   : > { %2471 = vmatmul.mubr.msk.bf16.vlgmr.msra.gmra.mxu0 %vm1291_vm2, %v1388_v13  ;;  %v1375_v18 = vmul.f32 %v2667_v15, %v2649_v53  ;;  %v2628_v53 = vld [vmem:[%s3285_s6 + $0x40] sm:$0xff]  }
 0x2ff   : > { %2481 = vmatpush3.bf16.msra.mxu0 %v2602_v16  ;;  %2482 = vmatprep.mubr.msk.bf16.mxu0 %vm2784_vm1, %v2783_v28  ;;  %1384 = vst.msk [vmem:[%s3062_s20 + $0x20] sm:$0xff] %vm1291_vm2, %v1376_v17 }
 0x300   : > { %v2669_v19 = vpop.eup %2668  ;;  %v1389_v20 = vpack.c.bf16 %v1375_v18, %v1374_v10  ;;  %2400 = vmatprep.subr.bf16.mxu0 %v2604_v14  ;;  %1383 = vst.msk [vmem:[%s3062_s20 + $0x18] sm:$0xff] %vm1291_vm2, %v1375_v18 }
 0x301   : > { %v2671_v22 = vpop.eup %2670  ;;  %v1378_v23 = vmul.f32 %v2669_v19, %v2653_v56  ;;  %v2635_v56 = vld [vmem:[%s3285_s6 + $0xc8] sm:$0xff]  }
 0x302   : > { %2477 = vmatmul.mubr.msk.bf16.vlgmr.msra.gmra.mxu1 %vm1291_vm2, %v1389_v20  ;;  %v1377_v25 = vmul.f32 %v2671_v22, %v2655_v57  ;;  %v2636_v57 = vld [vmem:[%s3285_s6 + $0x88] sm:$0xff]  }
 0x303   : > { %2487 = vmatpush3.bf16.msra.mxu1 %v2603_v24  ;;  %2488 = vmatprep.mubr.msk.bf16.mxu1 %vm2784_vm1, %v2783_v28  ;;  %1386 = vst.msk [vmem:[%s3062_s20 + $0x30] sm:$0xff] %vm1291_vm2, %v1378_v23  ;;  %v2607_v28 = vld [vmem:[%s3285_s6 + $0x30] sm:$0xff]  }
 0x304   : > { %v1390_v27 = vpack.c.bf16 %v1377_v25, %v1376_v17  ;;  %2422 = vmatprep.subr.bf16.mxu1 %v2609_v21  ;;  %1385 = vst.msk [vmem:[%s3062_s20 + $0x28] sm:$0xff] %vm1291_vm2, %v1377_v25 }
 0x305   : > { %v2673_v30 = vpop.eup %2672 }
 0x306   : > { %v1379_v31 = vmul.f32 %v2673_v30, %v2657_v60  ;;  %2483 = vmatmul.mubr.msk.bf16.vlgmr.msra.gmra.mxu0 %vm1291_vm2, %v1390_v27 }
 0x307   : > { %2401 = vmatpush3.bf16.msra.mxu0 %v2605_v26 }
 0x308   : > { %v1391_v36 = vpack.c.bf16 %v1379_v31, %v1378_v23  ;;  %2402 = vmatprep.subr.bf16.mxu0 %v2606_v29  ;;  %1387 = vst.msk [vmem:[%s3062_s20 + $0x38] sm:$0xff] %vm1291_vm2, %v1379_v31  ;;  %s2680_s20 = scalar_lea.vmem %s2679_s17, 2048 }
 0x309   : > { %p2682_p2 = scmp.lt.s32.totalorder %s2680_s20, %s2674_s28 }
 0x30a   : > { %2489 = vmatmul.mubr.msk.bf16.vlgmr.msra.gmra.mxu1 %vm1291_vm2, %v1391_v36 }
 0x30b   : > { %2403 = vmatpush3.bf16.msra.mxu0 %v2607_v28  ;;  %2423 = vmatpush3.bf16.msra.mxu1 %v2611_v33  ;;  %p2683_p3 = por %p2682_p2, %p2681_p1 }
 0x30c   : > { %2404 = vmatprep.subr.bf16.mxu0 %v2608_v37  ;;  %2424 = vmatprep.subr.bf16.mxu1 %v2613_v39 }
 0x30d   : > { %p2684_p5 = pnand %p2683_p3, %p2677_p0 }
 0x30f   : > { %2405 = vmatpush3.bf16.msra.mxu0 %v2610_v38  ;;  %2425 = vmatpush3.bf16.msra.mxu1 %v2615_v41 }
 0x310   : > { %2406 = vmatprep.subr.bf16.mxu0 %v2612_v34  ;;  %2426 = vmatprep.subr.bf16.mxu1 %v2617_v43 }
 0x313   : > { %2407 = vmatpush3.bf16.msra.mxu0 %v2614_v40  ;;  %2427 = vmatpush3.bf16.msra.mxu1 %v2619_v45 }
 0x314   : > { %2408 = vmatprep.subr.bf16.mxu0 %v2616_v42  ;;  %2428 = vmatprep.subr.bf16.mxu1 %v2621_v47 }
 0x317   : > { %2409 = vmatpush3.bf16.msra.mxu0 %v2618_v44  ;;  %2429 = vmatpush3.bf16.msra.mxu1 %v2623_v48 }
 0x318   : > { %2410 = vmatprep.subr.bf16.mxu0 %v2620_v46  ;;  %2430 = vmatprep.subr.bf16.mxu1 %v2625_v50 }
 0x31b   : > { %2411 = vmatpush3.bf16.msra.mxu0 %v2622_v32  ;;  %2431 = vmatpush3.bf16.msra.mxu1 %v2627_v52 }
 0x31c   : > { %2412 = vmatprep.subr.bf16.mxu0 %v2624_v49  ;;  %2432 = vmatprep.subr.bf16.mxu1 %v2629_v54 }
 0x31f   : > { %2413 = vmatpush3.bf16.msra.mxu0 %v2626_v51  ;;  %2433 = vmatpush3.bf16.msra.mxu1 %v2631_v35 }
 0x320   : > { %2414 = vmatprep.subr.bf16.mxu0 %v2628_v53  ;;  %2434 = vmatprep.subr.bf16.mxu1 %v2635_v56 }
 0x323   : > { %2415 = vmatpush3.bf16.msra.mxu0 %v2630_v55  ;;  %2435 = vmatpush3.bf16.msra.mxu1 %v2636_v57 }
 0x324   : > { %2436 = vmatprep.subr.bf16.mxu1 %v2637_v58 }
 0x327   : > { %2437 = vmatpush3.bf16.msra.mxu1 %v2638_v59 }
 0x3be   : > { %v1437_v60 = vpop.f32.mrf.mxu0 }
 0x3bf   : > { %v2334_v61 = vpack.c.bf16 %v1437_v60, %v1437_v60 }
 0x3c0   : > { %v2472_v62 = vpop.f32.mrf.mxu0 }
 0x3c1   : > { %1452 = vst [vmem:[#allocation4] sm:$0xf] %v2334_v61 }
 0x3c2   : > { %v1440_v63 = vpop.f32.mrf.mxu0  ;;  %v1499_v0 = vpop.f32.mrf.mxu1 }
 0x3c3   : > { %v2335_v1 = vpack.c.bf16 %v1440_v63, %v1440_v63  ;;  %v2336_v2 = vpack.c.bf16 %v1499_v0, %v1499_v0 }
 0x3c4   : > { %v2473_v3 = vpop.f32.mrf.mxu0  ;;  %v2478_v4 = vpop.f32.mrf.mxu1 }
 0x3c5   : > { %1453 = vst [vmem:[#allocation4 + $0x10] sm:$0xf] %v2335_v1  ;;  %1514 = vst [vmem:[#allocation4 + $0x4] sm:$0xf] %v2336_v2 }
 0x3c6   : > { %v1502_v5 = vpop.f32.mrf.mxu1  ;;  %v1561_v6 = vpop.f32.mrf.mxu0 }
 0x3c7   : > { %v2337_v7 = vpack.c.bf16 %v1502_v5, %v1502_v5  ;;  %v2338_v8 = vpack.c.bf16 %v1561_v6, %v1561_v6 }
 0x3c8   : > { %v2479_v9 = vpop.f32.mrf.mxu1  ;;  %v2484_v10 = vpop.f32.mrf.mxu0 }
 0x3c9   : > { %1515 = vst [vmem:[#allocation4 + $0x14] sm:$0xf] %v2337_v7  ;;  %1576 = vst [vmem:[#allocation4 + $0x8] sm:$0xf] %v2338_v8 }
 0x3ca   : > { %v1564_v11 = vpop.f32.mrf.mxu0  ;;  %v1623_v12 = vpop.f32.mrf.mxu1 }
 0x3cb   : > { %v2339_v13 = vpack.c.bf16 %v1564_v11, %v1564_v11  ;;  %v2340_v14 = vpack.c.bf16 %v1623_v12, %v1623_v12 }
 0x3cc   : > { %v2485_v15 = vpop.f32.mrf.mxu0  ;;  %v2490_v16 = vpop.f32.mrf.mxu1  ;;  %v2632_v20 = vld [vmem:[#allocation4] ss:$16 sps:$4 sm:$0xff]  }
 0x3cd   : > { %1577 = vst [vmem:[#allocation4 + $0x18] sm:$0xf] %v2339_v13  ;;  %1638 = vst [vmem:[#allocation4 + $0xc] sm:$0xf] %v2340_v14 }
 0x3ce   : > { %v1626_v17 = vpop.f32.mrf.mxu1 }
 0x3cf   : > { %v2341_v18 = vpack.c.bf16 %v1626_v17, %v1626_v17 }
 0x3d0   : > { %v2491_v19 = vpop.f32.mrf.mxu1  ;;  %v2634_v21 = vld [vmem:[#allocation4 + $0x4] ss:$16 sps:$4 sm:$0xff]  }
 0x3d1   : > { %1639 = vst [vmem:[#allocation4 + $0x1c] sm:$0xf] %v2341_v18  ;;  %1959 = vmatprep.mubr.bf16.mxu0 %v2634_v21 }
 0x3d2   : > { %1960 = vmatmul.mubr.bf16.vlgmr.msra.gmra.mxu0 %v2632_v20 }
 0x3d4   : > { %v2639_v22 = vld [vmem:[#allocation4 + $0x8] ss:$16 sps:$4 sm:$0xff]  }
 0x3d8   : > { %v2641_v23 = vld [vmem:[#allocation4 + $0xc] ss:$16 sps:$4 sm:$0xff]  }
 0x3d9   : > { %2000 = vmatprep.mubr.bf16.mxu1 %v2641_v23 }
 0x3da   : > { %2001 = vmatmul.mubr.bf16.vlgmr.msra.gmra.mxu1 %v2639_v22 }
 0x3db   : > { %2687 = shalt.err (!%p2684_p5)
}
 0x3dc   : > { %s2688_s1 = scalar_lea.hbm %s3191_s25, 1024  ;;  %s2692_s18 = scalar_lea.hbm %s3291_s12, 2048 }
 0x3dd   : > { %p2689_p6 = scmp.ne.s32.totalorder %s3191_s25, %s2688_s1  ;;  %p2693_p10 = scmp.lt.s32.totalorder %s3191_s25, %s3291_s12 }
 0x3de   : > { %p2694_p11 = scmp.lt.s32.totalorder %s2692_s18, %s2688_s1 }
 0x3df   : > { %p2690_p7 = pnand %p2689_p6, %p2894_p4 }
 0x3e0   : > { %p2695_p12 = por %p2694_p11, %p2693_p10 }
 0x3e1   : > { %p2691_p9 = pneg %p2690_p7 }
 0x3e3   : > { %p2696_p13 = pnand %p2695_p12, %p2691_p9 }
 0x3e5   : > { %2699 = shalt.err (!%p2696_p13)
}
 0x3e6   : > { %s3294_s28 = smov 128   ;;  %s2787_s17 = smov 8   ;;  %v2270_v29 = vld [vmem:[%s3289_s10] ss:$0 sm:$0xff] }
 0x3e7   : > { %s3302_s20 = scalar_lea.sflag [#allocation8], %s3059_s16  ;;  %s2193_s30 = sshll.u32 %s3059_s16, 4 }
 0x3e8   : > { %2493 = dma.vmem_to_hbm [thread:$0]  (%p2894_p4), %s3185_s27, 1024, %s3191_s25, %s3302_s20, %s3294_s28, %s3294_s28, %s2787_s17  }
 0x3e9   : > { %s467_s27 = scalar_lea.vmem [#allocation5], %s2193_s30  ;;  %s2342_s29 = sshll.u32 %s2772_s24, 8 }
 0x3ea   : > { %s2032_s25 = sshll.u32 %s467_s27, 4  ;;  %s3228_s20 = scalar_lea.hbm %s3290_s11, %s2342_s29  ;;  %s3230_s25 = int_to_ptr.vmem [resolvable:$true] %s2032_s25 }
 0x3eb   : > { %s2012_s19 = scalar_lea.sflag [#allocation6], %s3059_s16  ;;  %s2700_s1 = scalar_lea.vmem %s3230_s25, 256 }
 0x3ec   : > { %p2701_p0 = scmp.ne.s32.totalorder %s3230_s25, %s2700_s1  ;;  %s2788_s24 = smov [#allocation5]  }
 0x3ed   : > { %s2704_s30 = sshll.u32 %s2788_s24, 4  ;;  %s2705_s30 = int_to_ptr.vmem [resolvable:$false] %s2704_s30 }
 0x3ee   : > { %p2702_p1 = pnand %p2701_p0, %p2894_p4  ;;  %s2706_s28 = scalar_lea.vmem %s2705_s30, 512 }
 0x3ef   : > { %p2707_p3 = scmp.lt.s32.totalorder %s3230_s25, %s2705_s30  ;;  %p2708_p5 = scmp.lt.s32.totalorder %s2706_s28, %s2700_s1 }
 0x3f0   : > { %p2703_p2 = pneg %p2702_p1 }
 0x3f1   : > { %p2709_p6 = por %p2708_p5, %p2707_p3 }
 0x3f3   : > { %p2710_p7 = pnand %p2709_p6, %p2703_p2 }
 0x492   : > { %v2416_v24 = vpop.f32.mrf.mxu0 }
 0x494   : > { %v2417_v25 = vpop.f32.mrf.mxu0 }
 0x495   : > { %v2418_v27 = vadd.f32 %v2417_v25, %v2416_v24 }
 0x496   : > { %v2419_v26 = vpop.f32.mrf.mxu0 }
 0x497   : > { %v1962_v33 = vadd.f32 %v2418_v27, %v2270_v29 }
 0x498   : > { %v2420_v30 = vpop.f32.mrf.mxu0 }
 0x499   : > { %v2421_v36 = vadd.f32 %v2420_v30, %v2419_v26 }
 0x49a   : > { %v2438_v31 = vpop.f32.mrf.mxu1 }
 0x49b   : > { %v1965_v40 = vadd.f32 %v2421_v36, %v2270_v29 }
 0x49c   : > { %v2439_v28 = vpop.f32.mrf.mxu1 }
 0x49d   : > { %v2440_v37 = vadd.f32 %v2439_v28, %v2438_v31 }
 0x49e   : > { %v2441_v38 = vpop.f32.mrf.mxu1 }
 0x49f   : > { %v2003_v34 = vadd.f32 %v2440_v37, %v1962_v33 }
 0x4a0   : > { %v2442_v39 = vpop.f32.mrf.mxu1 }
 0x4a1   : > { %2009 = vst.msk [vmem:[%s467_s27] sm:$0xff] %vm575_vm0, %v2003_v34  ;;  %v2443_v41 = vadd.f32 %v2442_v39, %v2441_v38 }
 0x4a3   : > { %v2006_v42 = vadd.f32 %v2443_v41, %v1965_v40 }
 0x4a5   : > { %2010 = vst.msk [vmem:[%s467_s27 + $0x8] sm:$0xff] %vm575_vm0, %v2006_v42 }
 0x4a6   : > { %2713 = shalt.err (!%p2710_p7)
}
 0x4a7   : > { %s2714_s27 = scalar_lea.hbm %s3228_s20, 256  ;;  %s2718_s18 = scalar_lea.hbm %s3290_s11, 512 }
 0x4a8   : > { %p2715_p9 = scmp.ne.s32.totalorder %s3228_s20, %s2714_s27  ;;  %p2719_p12 = scmp.lt.s32.totalorder %s3228_s20, %s3290_s11 }
 0x4a9   : > { %p2720_p13 = scmp.lt.s32.totalorder %s2718_s18, %s2714_s27 }
 0x4aa   : > { %p2716_p10 = pnand %p2715_p9, %p2894_p4 }
 0x4ab   : > { %p2721_p0 = por %p2720_p13, %p2719_p12 }
 0x4ac   : > { %p2717_p11 = pneg %p2716_p10 }
 0x4ae   : > { %p2722_p1 = pnand %p2721_p0, %p2717_p11 }
 0x4b0   : > { %2725 = shalt.err (!%p2722_p1)
}
 0x4b1   : > { %s3303_s28 = smov 128  }
 0x4b2   : > { %2492 = dma.vmem_to_hbm [thread:$0]  (%p2894_p4), %s3230_s25, 256, %s3228_s20, %s2012_s19, %s3303_s28, %s3303_s28, %s2787_s17  }
 0x4b3 PF: > { %p2503_p2 = scmp.ge.s32.totalorder %s2780_s26, 2  ;;  %s2065_s1 = sand.u32 1, %s2760_s21  }
 0x4b4   : > { %s2066_s30 = scalar_lea.sflag [#allocation6], %s2065_s1 }
 0x4b5   : > { %p2497_p3 = pnand %p2503_p2, %p2901_p8 }
 0x4b7   : > { %p2498_p5 = pneg %p2497_p3 }
 0x4b9   : > { %2751 = dma.done.wait (%p2498_p5), %s2066_s30, 256  }
 0x4ba   : > { %2753 = vsyncadd (%p2498_p5), %s2066_s30, 4294967040  ;;  %s2075_s27 = scalar_lea.sflag [#allocation8], %s2065_s1 }
 0x4bb   : > { %2755 = dma.done.wait (%p2498_p5), %s2075_s27, 1024  }
 0x4bc   : > { %2757 = vsyncadd (%p2498_p5), %s2075_s27, 4294966272  ;;  %s29_s26 = sadd.s32 1, %s2780_s26   ;;  %s3304_s13 = sld [smem:[#allocation13_spill]] }
 0x4bd   : > { %p26_p6 = scmp.ge.s32.totalorder %s29_s26, 4   ;;  %s3305_s24 = sld [smem:[#allocation11_spill]] }
 0x4be   : > { %s3306_s25 = sld [smem:[#allocation12_spill]]  ;;  %s3307_s21 = smov %s2764_s22 }
 0x4bf   : > { %s3308_s22 = smov %s2768_s23  ;;  %28 = sbr.rel (!%p26_p6) target bundleno = 8 (0x8), region = 128 }
 0x4c2   : > { %s3309_s23 = smov %s3304_s13 }
 0x4c4   :  { %2080 = vsyncpa [#allocation6], 1 }
 0x4c5   :  { %2082 = vsyncpa [#allocation6 + $0x1], 1 }
 0x4c6   :  { %2083 = vsyncpa [#allocation8], 1 }
 0x4c7   :  { %2085 = vsyncpa [#allocation8 + $0x1], 1 }

</bundles_post_ra>
